<compile_context>
chip_gen: v5e
topology: v5e:2x2
jax: 0.10.0
libtpu: 0.0.40
codegen_flags: <defaults>
</compile_context>

<pallas_src>
import jax
import jax.numpy as jnp
import numpy as np
from jax.experimental import pallas as pl
from jax.experimental.pallas import tpu as pltpu

IMAGE_W = 200
IMAGE_H = 200
LATENT = 30
KS = 20                                     # conv kernel == stride (non-overlapping)
C_IN = 3
P = (IMAGE_H // KS) * (IMAGE_W // KS)       # 100 patches  -> View([-1, 100])
D = C_IN * KS * KS                          # 1200 patch features, ordered (c, kh, kw)
HID = 400
OUT_DIM = C_IN * IMAGE_W * IMAGE_H          # 120000
TN = 15360                                  # decoder output tile (multiple of 128)
N_TILES = pl.cdiv(OUT_DIM, TN)              # 8 tiles (even megacore split on v7x)
N_PAD = N_TILES * TN                        # 122880 (weights/bias padded; output is not)


# ---------------------------------------------------------------------------
# Kernel A: encoder conv (per-patch dot on the MXU) + sigmoid, mean/logvar heads
#           + sigmoid, reparameterize (z = mean + eps*exp(0.5*logvar)), first
#           decoder Linear(latent,400) + ReLU.  Tiny; whole-array VMEM blocks,
#           no grid.  Unrolled over the (static, small) batch so every
#           contraction is a plain 2-D MXU matmul with no relayouts.
#           h is emitted directly in bf16 for the decoder weight-stream kernel.
# ---------------------------------------------------------------------------
def _encode_kernel(pg_ref, cw_ref, cb_ref, wm_ref, bm_ref, ws_ref, bs_ref,
                   eps_ref, w1_ref, b1_ref,
                   mean_ref, logvar_ref, z_ref, h_ref):
    cw = cw_ref[...]          # [1, D]
    wm = wm_ref[...]          # [P, L]
    ws = ws_ref[...]          # [P, L]
    w1 = w1_ref[...]          # [L, HID]
    for b in range(pg_ref.shape[0]):          # static unroll, B is tiny
        # Conv2d(3,1,20,stride=20) == per-patch dot product: (1,D) @ (D,P) on the MXU.
        h1 = jax.nn.sigmoid(
            jnp.dot(cw, pg_ref[b], preferred_element_type=jnp.float32) + cb_ref[...])
        mean = jax.nn.sigmoid(
            jnp.dot(h1, wm, preferred_element_type=jnp.float32) + bm_ref[...])
        logvar = jax.nn.sigmoid(
            jnp.dot(h1, ws, preferred_element_type=jnp.float32) + bs_ref[...])
        z = mean + eps_ref[pl.ds(b, 1), :] * jnp.exp(0.5 * logvar)   # reparameterize
        h = jnp.maximum(
            jnp.dot(z, w1, preferred_element_type=jnp.float32) + b1_ref[...], 0.0)
        mean_ref[pl.ds(b, 1), :] = mean
        logvar_ref[pl.ds(b, 1), :] = logvar
        z_ref[pl.ds(b, 1), :] = z
        h_ref[pl.ds(b, 1), :] = h.astype(h_ref.dtype)      # bf16 for the decoder stream


def encode_and_hidden(pg, cw, cb, wm, bm, ws, bs, eps, w1, b1):
    B = pg.shape[0]
    L = wm.shape[1]
    H = w1.shape[1]
    out_shapes = (jax.ShapeDtypeStruct((B, L), jnp.float32),
                  jax.ShapeDtypeStruct((B, L), jnp.float32),
                  jax.ShapeDtypeStruct((B, L), jnp.float32),
                  jax.ShapeDtypeStruct((B, H), jnp.bfloat16))
    args = (pg, cw, cb, wm, bm, ws, bs, eps, w1, b1)
    vmem_spec = pl.BlockSpec(memory_space=pltpu.MemorySpace.VMEM)
    return pl.pallas_call(
        _encode_kernel,
        out_shape=out_shapes,
        in_specs=[vmem_spec] * len(args),
        out_specs=tuple(vmem_spec for _ in out_shapes),
    )(*args)


# ---------------------------------------------------------------------------
# Kernel B: big decoder matmul  out = sigmoid(h @ W2 + b2), tiled over N.
# W2 is streamed from HBM as bf16 tile-major (one contiguous DMA per tile),
# f32 MXU accumulation; h stays resident in VMEM.  The output is unpadded:
# the final ragged tile (cols 107520..120000) has its store masked by Pallas.
# ---------------------------------------------------------------------------
def _decoder_kernel(h_ref, w2_ref, b2_ref, o_ref):
    acc = jnp.dot(h_ref[...], w2_ref[...], preferred_element_type=jnp.float32)
    o_ref[...] = jax.nn.sigmoid(acc + b2_ref[...])


def decode_big(h_bf16, w2t_bf16, b2p):
    B, K = h_bf16.shape
    n_tiles, kw, tn = w2t_bf16.shape
    assert kw == K and tn == TN and b2p.shape == (1, n_tiles * TN)
    return pl.pallas_call(
        _decoder_kernel,
        out_shape=jax.ShapeDtypeStruct((B, OUT_DIM), jnp.float32),   # unpadded
        grid=(n_tiles,),
        in_specs=[pl.BlockSpec((B, K), lambda j: (0, 0)),                    # h: resident
                  pl.BlockSpec((pl.Squeezed(), K, TN), lambda j: (j, 0, 0)), # bf16 tile DMA
                  pl.BlockSpec((1, TN), lambda j: (0, j))],                  # padded bias
        out_specs=pl.BlockSpec((B, TN), lambda j: (0, j)),   # last tile store is masked
        compiler_params=pltpu.CompilerParams(
            dimension_semantics=("parallel",),     # v7x megacore: 8 tiles -> 4/4 per TC
            vmem_limit_bytes=40 << 20),            # 2 x 12.3MB bf16 w2 tiles + headroom
    )(h_bf16, w2t_bf16, b2p)


# ---------------------------------------------------------------------------
# Glue: patch extraction (pure reshape/transpose in XLA) and full forward pass.
# ---------------------------------------------------------------------------
def extract_patches(x):
    # x: [B, 3, H, W] -> [B, D, P] with D ordered (c, kh, kw) to match
    # Conv2d.weight.reshape(1, D), and P ordered (oh, ow) to match View([-1, 100]).
    B = x.shape[0]
    xr = x.reshape(B, C_IN, IMAGE_H // KS, KS, IMAGE_W // KS, KS)   # b,c,oh,kh,ow,kw
    xr = xr.transpose(0, 1, 3, 5, 2, 4)                             # b,c,kh,kw,oh,ow
    return xr.reshape(B, D, P)


def conv_vae_forward(x, params, eps):
    pg = extract_patches(x)
    mean, logvar, z, h = encode_and_hidden(
        pg,
        params["conv_w"], params["conv_b"],
        params["wm"], params["bm"], params["ws"], params["bs"],
        eps, params["w1"], params["b1"])
    recon = decode_big(h, params["w2t"], params["b2p"])
    return recon, mean, logvar, z


# ---------------------------------------------------------------------------
# Pure-JAX reference (same parameters, same eps, same bf16 weight values).
# ---------------------------------------------------------------------------
def reference_forward(x, params, eps):
    conv_w4 = params["conv_w"].reshape(1, C_IN, KS, KS)
    conv = jax.lax.conv_general_dilated(
        x, conv_w4, window_strides=(KS, KS), padding="VALID",
        dimension_numbers=("NCHW", "OIHW", "NCHW"))
    h1 = jax.nn.sigmoid(conv + params["conv_b"][0, 0]).reshape(-1, P)
    mean = jax.nn.sigmoid(h1 @ params["wm"] + params["bm"])
    logvar = jax.nn.sigmoid(h1 @ params["ws"] + params["bs"])
    z = mean + eps * jnp.exp(0.5 * logvar)
    h = jnp.maximum(z @ params["w1"] + params["b1"], 0.0)
    recon = jax.nn.sigmoid(
        jnp.dot(h.astype(jnp.bfloat16), params["w2_ref"],
                preferred_element_type=jnp.float32)
        + params["b2p"][:, :OUT_DIM])
    return recon, mean, logvar, z


if __name__ == "__main__":
    B = 2
    key = jax.random.PRNGKey(0)
    ks = jax.random.split(key, 12)

    # Deterministic synthetic parameters (torch shapes, pre-transposed for x @ W).
    conv_w = (jax.random.normal(ks[0], (1, C_IN, KS, KS), jnp.float32) * 0.05
              ).reshape(1, D)                                        # [1, 1200] (c,kh,kw)
    conv_b = jax.random.normal(ks[1], (1, 1), jnp.float32) * 0.05
    wm = jax.random.normal(ks[2], (P, LATENT), jnp.float32) * 0.1    # Linear(100,30).W^T
    bm = jax.random.normal(ks[3], (1, LATENT), jnp.float32) * 0.1
    ws = jax.random.normal(ks[4], (P, LATENT), jnp.float32) * 0.1    # Linear(100,30).W^T
    bs = jax.random.normal(ks[5], (1, LATENT), jnp.float32) * 0.1
    w1 = jax.random.normal(ks[6], (LATENT, HID), jnp.float32) * 0.1  # Linear(30,400).W^T
    b1 = jax.random.normal(ks[7], (1, HID), jnp.float32) * 0.1
    # Linear(400, 120000).W^T: stored/streamed as bf16.  The kernel copy is padded to
    # N_PAD and reshaped tile-major (N_TILES, HID, TN) so each grid step is one
    # contiguous DMA; the reference keeps the identical unpadded bf16 values.
    w2_ref = (jax.random.normal(ks[8], (HID, OUT_DIM), jnp.float32) * 0.02
              ).astype(jnp.bfloat16)
    w2t = jnp.pad(w2_ref, ((0, 0), (0, N_PAD - OUT_DIM))
                  ).reshape(HID, N_TILES, TN).transpose(1, 0, 2)     # [8, 400, 15360]
    b2p = jnp.pad(jax.random.normal(ks[9], (1, OUT_DIM), jnp.float32) * 0.02,
                  ((0, 0), (0, N_PAD - OUT_DIM)))

    params = dict(conv_w=conv_w, conv_b=conv_b, wm=wm, bm=bm, ws=ws, bs=bs,
                  w1=w1, b1=b1, w2t=w2t, w2_ref=w2_ref, b2p=b2p)

    x = jax.random.normal(ks[10], (B, C_IN, IMAGE_H, IMAGE_W), jnp.float32)
    # TODO(synk): torch.randn_like uses torch's global RNG inside reparameterize; eps is
    # generated deterministically with jax.random instead and fed to the kernel.
    eps = jax.random.normal(ks[11], (B, LATENT), jnp.float32)

    recon, mean, logvar, z = conv_vae_forward(x, params, eps)
    jax.block_until_ready((recon, mean, logvar, z))

    r_recon, r_mean, r_logvar, r_z = reference_forward(x, params, eps)
    np.testing.assert_allclose(np.asarray(mean), np.asarray(r_mean), rtol=1e-4, atol=1e-4)
    np.testing.assert_allclose(np.asarray(logvar), np.asarray(r_logvar), rtol=1e-4, atol=1e-4)
    np.testing.assert_allclose(np.asarray(z), np.asarray(r_z), rtol=1e-4, atol=1e-4)
    # bf16 weight streaming in the decoder => slightly looser reconstruction tolerance.
    np.testing.assert_allclose(np.asarray(recon), np.asarray(r_recon), rtol=1e-3, atol=1e-3)

    assert recon.shape == (B, OUT_DIM) and mean.shape == (B, LATENT)
    assert logvar.shape == (B, LATENT) and z.shape == (B, LATENT)
    print("KERNEL_OK")
</pallas_src>

<mosaic_0001>
module attributes {stable_mosaic.version = 11 : i64} {
  func.func @_encode_kernel(%arg0: memref<2x1200x100xf32, #tpu.memory_space<vmem>>, %arg1: memref<1x1200xf32, #tpu.memory_space<vmem>>, %arg2: memref<1x1xf32, #tpu.memory_space<vmem>>, %arg3: memref<100x30xf32, #tpu.memory_space<vmem>>, %arg4: memref<1x30xf32, #tpu.memory_space<vmem>>, %arg5: memref<100x30xf32, #tpu.memory_space<vmem>>, %arg6: memref<1x30xf32, #tpu.memory_space<vmem>>, %arg7: memref<2x30xf32, #tpu.memory_space<vmem>>, %arg8: memref<30x400xf32, #tpu.memory_space<vmem>>, %arg9: memref<1x400xf32, #tpu.memory_space<vmem>>, %arg10: memref<2x30xf32, #tpu.memory_space<vmem>>, %arg11: memref<2x30xf32, #tpu.memory_space<vmem>>, %arg12: memref<2x30xf32, #tpu.memory_space<vmem>>, %arg13: memref<2x400xbf16, #tpu.memory_space<vmem>>) attributes {dimension_semantics = [], scalar_prefetch = 0 : i64, scratch_operands = 0 : i64, tpu.core_type = #tpu.core_type<tc>} {
    %c0 = arith.constant 0 : index
    %c0_0 = arith.constant 0 : index
    %0 = vector.load %arg1[%c0, %c0_0] : memref<1x1200xf32, #tpu.memory_space<vmem>>, vector<1x1200xf32>
    %c0_1 = arith.constant 0 : index
    %c0_2 = arith.constant 0 : index
    %1 = vector.load %arg3[%c0_1, %c0_2] : memref<100x30xf32, #tpu.memory_space<vmem>>, vector<100x30xf32>
    %c0_3 = arith.constant 0 : index
    %c0_4 = arith.constant 0 : index
    %2 = vector.load %arg5[%c0_3, %c0_4] : memref<100x30xf32, #tpu.memory_space<vmem>>, vector<100x30xf32>
    %c0_5 = arith.constant 0 : index
    %c0_6 = arith.constant 0 : index
    %3 = vector.load %arg8[%c0_5, %c0_6] : memref<30x400xf32, #tpu.memory_space<vmem>>, vector<30x400xf32>
    %c0_7 = arith.constant 0 : index
    %c0_8 = arith.constant 0 : index
    %c0_9 = arith.constant 0 : index
    %4 = vector.load %arg0[%c0_7, %c0_8, %c0_9] : memref<2x1200x100xf32, #tpu.memory_space<vmem>>, vector<1x1200x100xf32>
    %5 = vector.shape_cast %4 : vector<1x1200x100xf32> to vector<1200x100xf32>
    %cst = arith.constant dense<0.000000e+00> : vector<1x100xf32>
    %6 = tpu.matmul %0, %5, %cst {dimension_numbers = #tpu.dot_dimension_numbers<[1], [0], [0], [1], [0, 0, 1, 1], [], []>} : vector<1x1200xf32>, vector<1200x100xf32>, vector<1x100xf32> -> vector<1x100xf32>
    %c0_10 = arith.constant 0 : index
    %c0_11 = arith.constant 0 : index
    %7 = vector.load %arg2[%c0_10, %c0_11] : memref<1x1xf32, #tpu.memory_space<vmem>>, vector<1x1xf32>
    %8 = vector.broadcast %7 : vector<1x1xf32> to vector<1x100xf32>
    %9 = arith.addf %6, %8 : vector<1x100xf32>
    %10 = arith.negf %9 : vector<1x100xf32>
    %11 = math.exp %10 : vector<1x100xf32>
    %cst_12 = arith.constant 1.000000e+00 : f32
    %12 = vector.broadcast %cst_12 : f32 to vector<1x100xf32>
    %13 = arith.addf %12, %11 : vector<1x100xf32>
    %14 = arith.divf %12, %13 : vector<1x100xf32>
    %cst_13 = arith.constant dense<0.000000e+00> : vector<1x30xf32>
    %15 = tpu.matmul %14, %1, %cst_13 {dimension_numbers = #tpu.dot_dimension_numbers<[1], [0], [0], [1], [0, 0, 1, 1], [], []>} : vector<1x100xf32>, vector<100x30xf32>, vector<1x30xf32> -> vector<1x30xf32>
    %c0_14 = arith.constant 0 : index
    %c0_15 = arith.constant 0 : index
    %16 = vector.load %arg4[%c0_14, %c0_15] : memref<1x30xf32, #tpu.memory_space<vmem>>, vector<1x30xf32>
    %17 = arith.addf %15, %16 : vector<1x30xf32>
    %18 = arith.negf %17 : vector<1x30xf32>
    %19 = math.exp %18 : vector<1x30xf32>
    %cst_16 = arith.constant 1.000000e+00 : f32
    %20 = vector.broadcast %cst_16 : f32 to vector<1x30xf32>
    %21 = arith.addf %20, %19 : vector<1x30xf32>
    %22 = arith.divf %20, %21 : vector<1x30xf32>
    %cst_17 = arith.constant dense<0.000000e+00> : vector<1x30xf32>
    %23 = tpu.matmul %14, %2, %cst_17 {dimension_numbers = #tpu.dot_dimension_numbers<[1], [0], [0], [1], [0, 0, 1, 1], [], []>} : vector<1x100xf32>, vector<100x30xf32>, vector<1x30xf32> -> vector<1x30xf32>
    %c0_18 = arith.constant 0 : index
    %c0_19 = arith.constant 0 : index
    %24 = vector.load %arg6[%c0_18, %c0_19] : memref<1x30xf32, #tpu.memory_space<vmem>>, vector<1x30xf32>
    %25 = arith.addf %23, %24 : vector<1x30xf32>
    %26 = arith.negf %25 : vector<1x30xf32>
    %27 = math.exp %26 : vector<1x30xf32>
    %cst_20 = arith.constant 1.000000e+00 : f32
    %28 = vector.broadcast %cst_20 : f32 to vector<1x30xf32>
    %29 = arith.addf %28, %27 : vector<1x30xf32>
    %30 = arith.divf %28, %29 : vector<1x30xf32>
    %c0_21 = arith.constant 0 : index
    %c0_22 = arith.constant 0 : index
    %31 = vector.load %arg7[%c0_21, %c0_22] : memref<2x30xf32, #tpu.memory_space<vmem>>, vector<1x30xf32>
    %cst_23 = arith.constant 5.000000e-01 : f32
    %32 = vector.broadcast %cst_23 : f32 to vector<1x30xf32>
    %33 = arith.mulf %32, %30 : vector<1x30xf32>
    %34 = math.exp %33 : vector<1x30xf32>
    %35 = arith.mulf %31, %34 : vector<1x30xf32>
    %36 = arith.addf %22, %35 : vector<1x30xf32>
    %cst_24 = arith.constant dense<0.000000e+00> : vector<1x400xf32>
    %37 = tpu.matmul %36, %3, %cst_24 {dimension_numbers = #tpu.dot_dimension_numbers<[1], [0], [0], [1], [0, 0, 1, 1], [], []>} : vector<1x30xf32>, vector<30x400xf32>, vector<1x400xf32> -> vector<1x400xf32>
    %c0_25 = arith.constant 0 : index
    %c0_26 = arith.constant 0 : index
    %38 = vector.load %arg9[%c0_25, %c0_26] : memref<1x400xf32, #tpu.memory_space<vmem>>, vector<1x400xf32>
    %39 = arith.addf %37, %38 : vector<1x400xf32>
    %cst_27 = arith.constant 0.000000e+00 : f32
    %40 = vector.broadcast %cst_27 : f32 to vector<1x400xf32>
    %41 = arith.maximumf %39, %40 : vector<1x400xf32>
    %c0_28 = arith.constant 0 : index
    %c0_29 = arith.constant 0 : index
    %42 = vector.load %arg10[%c0_28, %c0_29] : memref<2x30xf32, #tpu.memory_space<vmem>>, vector<1x30xf32>
    tpu.vector_store %arg10[%c0_28, %c0_29], %22 {strides = array<i32>} : memref<2x30xf32, #tpu.memory_space<vmem>>, vector<1x30xf32>,
    %c0_30 = arith.constant 0 : index
    %c0_31 = arith.constant 0 : index
    %43 = vector.load %arg11[%c0_30, %c0_31] : memref<2x30xf32, #tpu.memory_space<vmem>>, vector<1x30xf32>
    tpu.vector_store %arg11[%c0_30, %c0_31], %30 {strides = array<i32>} : memref<2x30xf32, #tpu.memory_space<vmem>>, vector<1x30xf32>,
    %c0_32 = arith.constant 0 : index
    %c0_33 = arith.constant 0 : index
    %44 = vector.load %arg12[%c0_32, %c0_33] : memref<2x30xf32, #tpu.memory_space<vmem>>, vector<1x30xf32>
    tpu.vector_store %arg12[%c0_32, %c0_33], %36 {strides = array<i32>} : memref<2x30xf32, #tpu.memory_space<vmem>>, vector<1x30xf32>,
    %45 = arith.truncf %41 : vector<1x400xf32> to vector<1x400xbf16>
    %c0_34 = arith.constant 0 : index
    %c0_35 = arith.constant 0 : index
    %46 = vector.load %arg13[%c0_34, %c0_35] : memref<2x400xbf16, #tpu.memory_space<vmem>>, vector<1x400xbf16>
    tpu.vector_store %arg13[%c0_34, %c0_35], %45 {strides = array<i32>} : memref<2x400xbf16, #tpu.memory_space<vmem>>, vector<1x400xbf16>,
    %c1 = arith.constant 1 : index
    %c0_36 = arith.constant 0 : index
    %c0_37 = arith.constant 0 : index
    %47 = vector.load %arg0[%c1, %c0_36, %c0_37] : memref<2x1200x100xf32, #tpu.memory_space<vmem>>, vector<1x1200x100xf32>
    %48 = vector.shape_cast %47 : vector<1x1200x100xf32> to vector<1200x100xf32>
    %cst_38 = arith.constant dense<0.000000e+00> : vector<1x100xf32>
    %49 = tpu.matmul %0, %48, %cst_38 {dimension_numbers = #tpu.dot_dimension_numbers<[1], [0], [0], [1], [0, 0, 1, 1], [], []>} : vector<1x1200xf32>, vector<1200x100xf32>, vector<1x100xf32> -> vector<1x100xf32>
    %c0_39 = arith.constant 0 : index
    %c0_40 = arith.constant 0 : index
    %50 = vector.load %arg2[%c0_39, %c0_40] : memref<1x1xf32, #tpu.memory_space<vmem>>, vector<1x1xf32>
    %51 = vector.broadcast %50 : vector<1x1xf32> to vector<1x100xf32>
    %52 = arith.addf %49, %51 : vector<1x100xf32>
    %53 = arith.negf %52 : vector<1x100xf32>
    %54 = math.exp %53 : vector<1x100xf32>
    %cst_41 = arith.constant 1.000000e+00 : f32
    %55 = vector.broadcast %cst_41 : f32 to vector<1x100xf32>
    %56 = arith.addf %55, %54 : vector<1x100xf32>
    %57 = arith.divf %55, %56 : vector<1x100xf32>
    %cst_42 = arith.constant dense<0.000000e+00> : vector<1x30xf32>
    %58 = tpu.matmul %57, %1, %cst_42 {dimension_numbers = #tpu.dot_dimension_numbers<[1], [0], [0], [1], [0, 0, 1, 1], [], []>} : vector<1x100xf32>, vector<100x30xf32>, vector<1x30xf32> -> vector<1x30xf32>
    %c0_43 = arith.constant 0 : index
    %c0_44 = arith.constant 0 : index
    %59 = vector.load %arg4[%c0_43, %c0_44] : memref<1x30xf32, #tpu.memory_space<vmem>>, vector<1x30xf32>
    %60 = arith.addf %58, %59 : vector<1x30xf32>
    %61 = arith.negf %60 : vector<1x30xf32>
    %62 = math.exp %61 : vector<1x30xf32>
    %cst_45 = arith.constant 1.000000e+00 : f32
    %63 = vector.broadcast %cst_45 : f32 to vector<1x30xf32>
    %64 = arith.addf %63, %62 : vector<1x30xf32>
    %65 = arith.divf %63, %64 : vector<1x30xf32>
    %cst_46 = arith.constant dense<0.000000e+00> : vector<1x30xf32>
    %66 = tpu.matmul %57, %2, %cst_46 {dimension_numbers = #tpu.dot_dimension_numbers<[1], [0], [0], [1], [0, 0, 1, 1], [], []>} : vector<1x100xf32>, vector<100x30xf32>, vector<1x30xf32> -> vector<1x30xf32>
    %c0_47 = arith.constant 0 : index
    %c0_48 = arith.constant 0 : index
    %67 = vector.load %arg6[%c0_47, %c0_48] : memref<1x30xf32, #tpu.memory_space<vmem>>, vector<1x30xf32>
    %68 = arith.addf %66, %67 : vector<1x30xf32>
    %69 = arith.negf %68 : vector<1x30xf32>
    %70 = math.exp %69 : vector<1x30xf32>
    %cst_49 = arith.constant 1.000000e+00 : f32
    %71 = vector.broadcast %cst_49 : f32 to vector<1x30xf32>
    %72 = arith.addf %71, %70 : vector<1x30xf32>
    %73 = arith.divf %71, %72 : vector<1x30xf32>
    %c1_50 = arith.constant 1 : index
    %c0_51 = arith.constant 0 : index
    %74 = vector.load %arg7[%c1_50, %c0_51] : memref<2x30xf32, #tpu.memory_space<vmem>>, vector<1x30xf32>
    %cst_52 = arith.constant 5.000000e-01 : f32
    %75 = vector.broadcast %cst_52 : f32 to vector<1x30xf32>
    %76 = arith.mulf %75, %73 : vector<1x30xf32>
    %77 = math.exp %76 : vector<1x30xf32>
    %78 = arith.mulf %74, %77 : vector<1x30xf32>
    %79 = arith.addf %65, %78 : vector<1x30xf32>
    %cst_53 = arith.constant dense<0.000000e+00> : vector<1x400xf32>
    %80 = tpu.matmul %79, %3, %cst_53 {dimension_numbers = #tpu.dot_dimension_numbers<[1], [0], [0], [1], [0, 0, 1, 1], [], []>} : vector<1x30xf32>, vector<30x400xf32>, vector<1x400xf32> -> vector<1x400xf32>
    %c0_54 = arith.constant 0 : index
    %c0_55 = arith.constant 0 : index
    %81 = vector.load %arg9[%c0_54, %c0_55] : memref<1x400xf32, #tpu.memory_space<vmem>>, vector<1x400xf32>
    %82 = arith.addf %80, %81 : vector<1x400xf32>
    %cst_56 = arith.constant 0.000000e+00 : f32
    %83 = vector.broadcast %cst_56 : f32 to vector<1x400xf32>
    %84 = arith.maximumf %82, %83 : vector<1x400xf32>
    %c1_57 = arith.constant 1 : index
    %c0_58 = arith.constant 0 : index
    %85 = vector.load %arg10[%c1_57, %c0_58] : memref<2x30xf32, #tpu.memory_space<vmem>>, vector<1x30xf32>
    tpu.vector_store %arg10[%c1_57, %c0_58], %65 {strides = array<i32>} : memref<2x30xf32, #tpu.memory_space<vmem>>, vector<1x30xf32>,
    %c1_59 = arith.constant 1 : index
    %c0_60 = arith.constant 0 : index
    %86 = vector.load %arg11[%c1_59, %c0_60] : memref<2x30xf32, #tpu.memory_space<vmem>>, vector<1x30xf32>
    tpu.vector_store %arg11[%c1_59, %c0_60], %73 {strides = array<i32>} : memref<2x30xf32, #tpu.memory_space<vmem>>, vector<1x30xf32>,
    %c1_61 = arith.constant 1 : index
    %c0_62 = arith.constant 0 : index
    %87 = vector.load %arg12[%c1_61, %c0_62] : memref<2x30xf32, #tpu.memory_space<vmem>>, vector<1x30xf32>
    tpu.vector_store %arg12[%c1_61, %c0_62], %79 {strides = array<i32>} : memref<2x30xf32, #tpu.memory_space<vmem>>, vector<1x30xf32>,
    %88 = arith.truncf %84 : vector<1x400xf32> to vector<1x400xbf16>
    %c1_63 = arith.constant 1 : index
    %c0_64 = arith.constant 0 : index
    %89 = vector.load %arg13[%c1_63, %c0_64] : memref<2x400xbf16, #tpu.memory_space<vmem>>, vector<1x400xbf16>
    tpu.vector_store %arg13[%c1_63, %c0_64], %88 {strides = array<i32>} : memref<2x400xbf16, #tpu.memory_space<vmem>>, vector<1x400xbf16>,
    return
  }
}

</mosaic_0001>

<bundles_post_ra>
// kernel: tpu_custom_call.1
= control target key start
LH: loop header
LB: loop body
LE: loop exit
PB: predicated region body
PF: predicated region fallthrough
CT: control target
= control target key end

     0   :  { %s3182_s0 = inlined_call_operand.vmem [shape: f32[2,1200,100], index: 0, kind: input, shape index: {}]   ;;  %s3183_s1 = inlined_call_operand.vmem [shape: f32[1,1200], index: 1, kind: input, shape index: {}]   ;;  %s3184_s2 = inlined_call_operand.<no memory space> [shape: f32[1,1], index: 2, kind: input, shape index: {}]   ;;  %s3185_s3 = inlined_call_operand.vmem [shape: f32[100,30], index: 3, kind: input, shape index: {}]   ;;  %s3186_s4 = inlined_call_operand.vmem [shape: f32[1,30], index: 4, kind: input, shape index: {}]   ;;  %s3187_s5 = inlined_call_operand.vmem [shape: f32[100,30], index: 5, kind: input, shape index: {}]   ;;  %s3188_s6 = inlined_call_operand.vmem [shape: f32[1,30], index: 6, kind: input, shape index: {}]   ;;  %s3189_s7 = inlined_call_operand.vmem [shape: f32[2,30], index: 7, kind: input, shape index: {}]   ;;  %s3190_s8 = inlined_call_operand.vmem [shape: f32[30,400], index: 8, kind: input, shape index: {}]   ;;  %s3191_s9 = inlined_call_operand.vmem [shape: f32[1,400], index: 9, kind: input, shape index: {}]   ;;  %s3192_s10 = inlined_call_operand.hbm [shape: f32[2,30], index: 10, kind: output, shape index: {0}]   ;;  %s3193_s11 = inlined_call_operand.hbm [shape: f32[2,30], index: 11, kind: output, shape index: {1}]   ;;  %s3194_s12 = inlined_call_operand.hbm [shape: f32[2,30], index: 12, kind: output, shape index: {2}]   ;;  %s3195_s13 = inlined_call_operand.hbm [shape: bf16[2,400], index: 13, kind: output, shape index: {3}]  }
   0x1   :  { %v19_v0 = vstv %s3184_s2 }
   0x2   :  { %20 = vst [vmem:[#allocation2] sm:$0x1] %v19_v0 }
   0x3   :  { %21 = vsyncpa [#allocation4], 0 }
   0x4   :  { %22 = vsyncpa [#allocation6], 0  ;;  %v103_v1 = vld [vmem:[%s3182_s0 + $0x78] sm:$0xff]  ;;  %v102_v2 = vld [vmem:[%s3182_s0 + $0x70] sm:$0xff] }
   0x5   :  { %269 = vmatpush.msra.mxu0 %v103_v1  ;;  %v135_v3 = vld [vmem:[%s3182_s0 + $0x178] sm:$0xff]  ;;  %v101_v4 = vld [vmem:[%s3182_s0 + $0x68] sm:$0xff]  ;;  %v134_v5 = vld [vmem:[%s3182_s0 + $0x170] sm:$0xff] }
   0x6   :  { %309 = vmatpush.msra.mxu2 %v135_v3  ;;  %v151_v6 = vld [vmem:[%s3182_s0 + $0x1f8] sm:$0xff]  ;;  %v133_v8 = vld [vmem:[%s3182_s0 + $0x168] sm:$0xff]  ;;  %v150_v9 = vld [vmem:[%s3182_s0 + $0x1f0] sm:$0xff] }
   0x7   :  { %270 = vmatpush.msra.mxu0 %v102_v2  ;;  %329 = vmatpush.msra.mxu3 %v151_v6  ;;  %v119_v7 = vld [vmem:[%s3182_s0 + $0xf8] sm:$0xff]  ;;  %v100_v10 = vld [vmem:[%s3182_s0 + $0x60] sm:$0xff]  ;;  %v118_v11 = vld [vmem:[%s3182_s0 + $0xf0] sm:$0xff] }
   0x8   :  { %310 = vmatpush.msra.mxu2 %v134_v5  ;;  %289 = vmatpush.msra.mxu1 %v119_v7  ;;  %v132_v12 = vld [vmem:[%s3182_s0 + $0x160] sm:$0xff]  ;;  %v149_v13 = vld [vmem:[%s3182_s0 + $0x1e8] sm:$0xff]  ;;  %v99_v15 = vld [vmem:[%s3182_s0 + $0x58] sm:$0xff] }
   0x9   :  { %271 = vmatpush.msra.mxu0 %v101_v4  ;;  %330 = vmatpush.msra.mxu3 %v150_v9  ;;  %v117_v14 = vld [vmem:[%s3182_s0 + $0xe8] sm:$0xff]  ;;  %v148_v16 = vld [vmem:[%s3182_s0 + $0x1e0] sm:$0xff]  ;;  %v131_v17 = vld [vmem:[%s3182_s0 + $0x158] sm:$0xff] }
   0xa   :  { %311 = vmatpush.msra.mxu2 %v133_v8  ;;  %290 = vmatpush.msra.mxu1 %v118_v11  ;;  %v116_v18 = vld [vmem:[%s3182_s0 + $0xe0] sm:$0xff]  ;;  %v98_v19 = vld [vmem:[%s3182_s0 + $0x50] sm:$0xff]  ;;  %v147_v20 = vld [vmem:[%s3182_s0 + $0x1d8] sm:$0xff] }
   0xb   :  { %272 = vmatpush.msra.mxu0 %v100_v10  ;;  %331 = vmatpush.msra.mxu3 %v149_v13  ;;  %v130_v21 = vld [vmem:[%s3182_s0 + $0x150] sm:$0xff]  ;;  %v115_v22 = vld [vmem:[%s3182_s0 + $0xd8] sm:$0xff]  ;;  %v97_v23 = vld [vmem:[%s3182_s0 + $0x48] sm:$0xff] }
   0xc   :  { %312 = vmatpush.msra.mxu2 %v132_v12  ;;  %291 = vmatpush.msra.mxu1 %v117_v14  ;;  %v146_v24 = vld [vmem:[%s3182_s0 + $0x1d0] sm:$0xff]  ;;  %v129_v25 = vld [vmem:[%s3182_s0 + $0x148] sm:$0xff]  ;;  %v96_v27 = vld [vmem:[%s3182_s0 + $0x40] sm:$0xff] }
   0xd   :  { %273 = vmatpush.msra.mxu0 %v99_v15  ;;  %332 = vmatpush.msra.mxu3 %v148_v16  ;;  %v114_v26 = vld [vmem:[%s3182_s0 + $0xd0] sm:$0xff]  ;;  %v145_v28 = vld [vmem:[%s3182_s0 + $0x1c8] sm:$0xff]  ;;  %v128_v29 = vld [vmem:[%s3182_s0 + $0x140] sm:$0xff] }
   0xe   :  { %313 = vmatpush.msra.mxu2 %v131_v17  ;;  %292 = vmatpush.msra.mxu1 %v116_v18  ;;  %v113_v30 = vld [vmem:[%s3182_s0 + $0xc8] sm:$0xff]  ;;  %v95_v31 = vld [vmem:[%s3182_s0 + $0x38] sm:$0xff]  ;;  %v144_v32 = vld [vmem:[%s3182_s0 + $0x1c0] sm:$0xff] }
   0xf   :  { %274 = vmatpush.msra.mxu0 %v98_v19  ;;  %333 = vmatpush.msra.mxu3 %v147_v20  ;;  %v127_v33 = vld [vmem:[%s3182_s0 + $0x138] sm:$0xff]  ;;  %v112_v34 = vld [vmem:[%s3182_s0 + $0xc0] sm:$0xff]  ;;  %v94_v35 = vld [vmem:[%s3182_s0 + $0x30] sm:$0xff] }
  0x10   :  { %314 = vmatpush.msra.mxu2 %v130_v21  ;;  %293 = vmatpush.msra.mxu1 %v115_v22  ;;  %v143_v36 = vld [vmem:[%s3182_s0 + $0x1b8] sm:$0xff]  ;;  %v126_v37 = vld [vmem:[%s3182_s0 + $0x130] sm:$0xff]  ;;  %v93_v39 = vld [vmem:[%s3182_s0 + $0x28] sm:$0xff] }
  0x11   :  { %275 = vmatpush.msra.mxu0 %v97_v23  ;;  %334 = vmatpush.msra.mxu3 %v146_v24  ;;  %v111_v38 = vld [vmem:[%s3182_s0 + $0xb8] sm:$0xff]  ;;  %v142_v40 = vld [vmem:[%s3182_s0 + $0x1b0] sm:$0xff]  ;;  %v125_v41 = vld [vmem:[%s3182_s0 + $0x128] sm:$0xff] }
  0x12   :  { %315 = vmatpush.msra.mxu2 %v129_v25  ;;  %294 = vmatpush.msra.mxu1 %v114_v26  ;;  %v110_v42 = vld [vmem:[%s3182_s0 + $0xb0] sm:$0xff]  ;;  %v92_v43 = vld [vmem:[%s3182_s0 + $0x20] sm:$0xff]  ;;  %v141_v44 = vld [vmem:[%s3182_s0 + $0x1a8] sm:$0xff] }
  0x13   :  { %276 = vmatpush.msra.mxu0 %v96_v27  ;;  %335 = vmatpush.msra.mxu3 %v145_v28  ;;  %v124_v45 = vld [vmem:[%s3182_s0 + $0x120] sm:$0xff]  ;;  %v109_v46 = vld [vmem:[%s3182_s0 + $0xa8] sm:$0xff]  ;;  %v91_v47 = vld [vmem:[%s3182_s0 + $0x18] sm:$0xff] }
  0x14   :  { %316 = vmatpush.msra.mxu2 %v128_v29  ;;  %295 = vmatpush.msra.mxu1 %v113_v30  ;;  %v140_v48 = vld [vmem:[%s3182_s0 + $0x1a0] sm:$0xff]  ;;  %v123_v49 = vld [vmem:[%s3182_s0 + $0x118] sm:$0xff]  ;;  %v90_v51 = vld [vmem:[%s3182_s0 + $0x10] sm:$0xff] }
  0x15   :  { %277 = vmatpush.msra.mxu0 %v95_v31  ;;  %336 = vmatpush.msra.mxu3 %v144_v32  ;;  %v108_v50 = vld [vmem:[%s3182_s0 + $0xa0] sm:$0xff]  ;;  %v139_v52 = vld [vmem:[%s3182_s0 + $0x198] sm:$0xff]  ;;  %v122_v53 = vld [vmem:[%s3182_s0 + $0x110] sm:$0xff] }
  0x16   :  { %317 = vmatpush.msra.mxu2 %v127_v33  ;;  %296 = vmatpush.msra.mxu1 %v112_v34  ;;  %v107_v54 = vld [vmem:[%s3182_s0 + $0x98] sm:$0xff]  ;;  %v89_v55 = vld [vmem:[%s3182_s0 + $0x8] sm:$0xff]  ;;  %v138_v56 = vld [vmem:[%s3182_s0 + $0x190] sm:$0xff] }
  0x17   :  { %278 = vmatpush.msra.mxu0 %v94_v35  ;;  %337 = vmatpush.msra.mxu3 %v143_v36  ;;  %v121_v57 = vld [vmem:[%s3182_s0 + $0x108] sm:$0xff]  ;;  %v106_v58 = vld [vmem:[%s3182_s0 + $0x90] sm:$0xff]  ;;  %v88_v59 = vld [vmem:[%s3182_s0] sm:$0xff] }
  0x18   :  { %318 = vmatpush.msra.mxu2 %v126_v37  ;;  %297 = vmatpush.msra.mxu1 %v111_v38  ;;  %v137_v60 = vld [vmem:[%s3182_s0 + $0x188] sm:$0xff]  ;;  %v167_v61 = vld [vmem:[%s3182_s0 + $0x278] sm:$0xff]  ;;  %v120_v62 = vld [vmem:[%s3182_s0 + $0x100] sm:$0xff] }
  0x19   :  { %279 = vmatpush.msra.mxu0 %v93_v39  ;;  %338 = vmatpush.msra.mxu3 %v142_v40  ;;  %v199_v63 = vld [vmem:[%s3182_s0 + $0x378] sm:$0xff]  ;;  %v105_v0 = vld [vmem:[%s3182_s0 + $0x88] sm:$0xff]  ;;  %v166_v1 = vld [vmem:[%s3182_s0 + $0x270] sm:$0xff] }
  0x1a   :  { %319 = vmatpush.msra.mxu2 %v125_v41  ;;  %298 = vmatpush.msra.mxu1 %v110_v42  ;;  %v136_v2 = vld [vmem:[%s3182_s0 + $0x180] sm:$0xff]  ;;  %v198_v3 = vld [vmem:[%s3182_s0 + $0x370] sm:$0xff]  ;;  %v215_v4 = vld [vmem:[%s3182_s0 + $0x3f8] sm:$0xff] }
  0x1b   :  { %280 = vmatpush.msra.mxu0 %v92_v43  ;;  %339 = vmatpush.msra.mxu3 %v141_v44  ;;  %v165_v5 = vld [vmem:[%s3182_s0 + $0x268] sm:$0xff]  ;;  %v104_v6 = vld [vmem:[%s3182_s0 + $0x80] sm:$0xff]  ;;  %v183_v7 = vld [vmem:[%s3182_s0 + $0x2f8] sm:$0xff] }
  0x1c   :  { %320 = vmatpush.msra.mxu2 %v124_v45  ;;  %299 = vmatpush.msra.mxu1 %v109_v46  ;;  %v197_v8 = vld [vmem:[%s3182_s0 + $0x368] sm:$0xff]  ;;  %v164_v9 = vld [vmem:[%s3182_s0 + $0x260] sm:$0xff]  ;;  %v214_v10 = vld [vmem:[%s3182_s0 + $0x3f0] sm:$0xff] }
  0x1d   :  { %281 = vmatpush.msra.mxu0 %v91_v47  ;;  %340 = vmatpush.msra.mxu3 %v140_v48  ;;  %v182_v11 = vld [vmem:[%s3182_s0 + $0x2f0] sm:$0xff]  ;;  %v196_v12 = vld [vmem:[%s3182_s0 + $0x360] sm:$0xff]  ;;  %v163_v13 = vld [vmem:[%s3182_s0 + $0x258] sm:$0xff] }
  0x1e   :  { %321 = vmatpush.msra.mxu2 %v123_v49  ;;  %300 = vmatpush.msra.mxu1 %v108_v50  ;;  %v213_v14 = vld [vmem:[%s3182_s0 + $0x3e8] sm:$0xff]  ;;  %v195_v16 = vld [vmem:[%s3182_s0 + $0x358] sm:$0xff]  ;;  %v162_v17 = vld [vmem:[%s3182_s0 + $0x250] sm:$0xff] }
  0x1f   :  { %282 = vmatpush.msra.mxu0 %v90_v51  ;;  %341 = vmatpush.msra.mxu3 %v139_v52  ;;  %v181_v15 = vld [vmem:[%s3182_s0 + $0x2e8] sm:$0xff]  ;;  %v212_v18 = vld [vmem:[%s3182_s0 + $0x3e0] sm:$0xff]  ;;  %v194_v20 = vld [vmem:[%s3182_s0 + $0x350] sm:$0xff] }
  0x20   :  { %322 = vmatpush.msra.mxu2 %v122_v53  ;;  %301 = vmatpush.msra.mxu1 %v107_v54  ;;  %v180_v19 = vld [vmem:[%s3182_s0 + $0x2e0] sm:$0xff]  ;;  %v161_v21 = vld [vmem:[%s3182_s0 + $0x248] sm:$0xff]  ;;  %v211_v22 = vld [vmem:[%s3182_s0 + $0x3d8] sm:$0xff] }
  0x21   :  { %283 = vmatpush.msra.mxu0 %v89_v55  ;;  %342 = vmatpush.msra.mxu3 %v138_v56  ;;  %v179_v23 = vld [vmem:[%s3182_s0 + $0x2d8] sm:$0xff]  ;;  %v193_v24 = vld [vmem:[%s3182_s0 + $0x348] sm:$0xff]  ;;  %v160_v25 = vld [vmem:[%s3182_s0 + $0x240] sm:$0xff] }
  0x22   :  { %323 = vmatpush.msra.mxu2 %v121_v57  ;;  %302 = vmatpush.msra.mxu1 %v106_v58  ;;  %v210_v26 = vld [vmem:[%s3182_s0 + $0x3d0] sm:$0xff]  ;;  %v192_v28 = vld [vmem:[%s3182_s0 + $0x340] sm:$0xff]  ;;  %v159_v29 = vld [vmem:[%s3182_s0 + $0x238] sm:$0xff] }
  0x23   :  { %284 = vmatpush.msra.mxu0 %v88_v59  ;;  %343 = vmatpush.msra.mxu3 %v137_v60  ;;  %v178_v27 = vld [vmem:[%s3182_s0 + $0x2d0] sm:$0xff]  ;;  %v209_v30 = vld [vmem:[%s3182_s0 + $0x3c8] sm:$0xff]  ;;  %v191_v32 = vld [vmem:[%s3182_s0 + $0x338] sm:$0xff] }
  0x24   :  { %324 = vmatpush.msra.mxu2 %v120_v62  ;;  %303 = vmatpush.msra.mxu1 %v105_v0  ;;  %v177_v31 = vld [vmem:[%s3182_s0 + $0x2c8] sm:$0xff] }
  0x25   :  { %349 = vmatpush.msrb.mxu0 %v167_v61  ;;  %344 = vmatpush.msra.mxu3 %v136_v2 }
  0x26   :  { %389 = vmatpush.msrb.mxu2 %v199_v63  ;;  %304 = vmatpush.msra.mxu1 %v104_v6 }
  0x27   :  { %350 = vmatpush.msrb.mxu0 %v166_v1  ;;  %409 = vmatpush.msrb.mxu3 %v215_v4 }
  0x28   :  { %390 = vmatpush.msrb.mxu2 %v198_v3  ;;  %369 = vmatpush.msrb.mxu1 %v183_v7 }
  0x29   :  { %351 = vmatpush.msrb.mxu0 %v165_v5  ;;  %410 = vmatpush.msrb.mxu3 %v214_v10 }
  0x2a   :  { %391 = vmatpush.msrb.mxu2 %v197_v8  ;;  %370 = vmatpush.msrb.mxu1 %v182_v11 }
  0x2b   :  { %352 = vmatpush.msrb.mxu0 %v164_v9  ;;  %411 = vmatpush.msrb.mxu3 %v213_v14 }
  0x2c   :  { %392 = vmatpush.msrb.mxu2 %v196_v12  ;;  %371 = vmatpush.msrb.mxu1 %v181_v15 }
  0x2d   :  { %353 = vmatpush.msrb.mxu0 %v163_v13  ;;  %412 = vmatpush.msrb.mxu3 %v212_v18 }
  0x2e   :  { %393 = vmatpush.msrb.mxu2 %v195_v16  ;;  %372 = vmatpush.msrb.mxu1 %v180_v19 }
  0x2f   :  { %354 = vmatpush.msrb.mxu0 %v162_v17  ;;  %413 = vmatpush.msrb.mxu3 %v211_v22 }
  0x30   :  { %394 = vmatpush.msrb.mxu2 %v194_v20  ;;  %373 = vmatpush.msrb.mxu1 %v179_v23 }
  0x31   :  { %355 = vmatpush.msrb.mxu0 %v161_v21  ;;  %414 = vmatpush.msrb.mxu3 %v210_v26 }
  0x32   :  { %395 = vmatpush.msrb.mxu2 %v193_v24 }
  0x33   :  { %356 = vmatpush.msrb.mxu0 %v160_v25 }
  0x34   :  { %23 = vsyncpa [#allocation9], 0  ;;  %v158_v33 = vld [vmem:[%s3182_s0 + $0x230] sm:$0xff]  ;;  %374 = vmatpush.msrb.mxu1 %v178_v27  ;;  %396 = vmatpush.msrb.mxu2 %v192_v28  ;;  %v208_v34 = vld [vmem:[%s3182_s0 + $0x3c0] sm:$0xff]  ;;  %v1718_v16 = vmov 0   ;;  %vm266_vm0 = vcmask 392192  }
  0x35   :  { %357 = vmatpush.msrb.mxu0 %v159_v29  ;;  %415 = vmatpush.msrb.mxu3 %v209_v30  ;;  %v176_v35 = vld [vmem:[%s3182_s0 + $0x2c0] sm:$0xff]  ;;  %v190_v36 = vld [vmem:[%s3182_s0 + $0x330] sm:$0xff]  ;;  %v157_v37 = vld [vmem:[%s3182_s0 + $0x228] sm:$0xff]  ;;  %vm493_vm1 = vcmask 1043456   ;;  %vm489_vm5 = vcmask 818176   ;;  %vm3202_vm7 = vcmask 1045504  }
  0x36   :  { %375 = vmatpush.msrb.mxu1 %v177_v31  ;;  %397 = vmatpush.msrb.mxu2 %v191_v32  ;;  %v207_v38 = vld [vmem:[%s3182_s0 + $0x3b8] sm:$0xff]  ;;  %v189_v40 = vld [vmem:[%s3182_s0 + $0x328] sm:$0xff]  ;;  %v2111_v41 = vld [vmem:[%s3183_s1] sm:$0xff]  ;;  %vm696_vm14 = vcmask 237568   ;;  %s1351_s16 = sshll.u32 %s3193_s11, 4  ;;  %s1719_s17 = smov [#allocation5]   ;;  %s1352_s16 = int_to_ptr.hbm [resolvable:$true] %s1351_s16 }
  0x37   :  { %358 = vmatpush.msrb.mxu0 %v158_v33  ;;  %416 = vmatpush.msrb.mxu3 %v208_v34  ;;  %v175_v39 = vld [vmem:[%s3182_s0 + $0x2b8] sm:$0xff]  ;;  %v156_v42 = vld [vmem:[%s3182_s0 + $0x220] sm:$0xff]  ;;  %v206_v43 = vld [vmem:[%s3182_s0 + $0x3b0] sm:$0xff]  ;;  %v249_v48 = vperm.slane %v2111_v41, 2  ;;  %v247_v52 = vperm.slane %v2111_v41, 0  ;;  %v250_v54 = vperm.slane %v2111_v41, 3 }
  0x38   :  { %376 = vmatpush.msrb.mxu1 %v176_v35  ;;  %398 = vmatpush.msrb.mxu2 %v190_v36  ;;  %v174_v44 = vld [vmem:[%s3182_s0 + $0x2b0] sm:$0xff]  ;;  %v188_v45 = vld [vmem:[%s3182_s0 + $0x320] sm:$0xff]  ;;  %v155_v46 = vld [vmem:[%s3182_s0 + $0x218] sm:$0xff]  ;;  %v248_v60 = vperm.slane %v2111_v41, 1  ;;  %v253_v6 = vperm.slane %v2111_v41, 6  ;;  %v3198_v10 = vperm.slane %v2111_v41, 4 }
  0x39   :  { %359 = vmatpush.msrb.mxu0 %v157_v37  ;;  %417 = vmatpush.msrb.mxu3 %v207_v38  ;;  %v205_v47 = vld [vmem:[%s3182_s0 + $0x3a8] sm:$0xff]  ;;  %v154_v50 = vld [vmem:[%s3182_s0 + $0x210] sm:$0xff]  ;;  %v187_v51 = vld [vmem:[%s3182_s0 + $0x318] sm:$0xff]  ;;  %v3200_v11 = vperm.slane %v2111_v41, 7  ;;  %v3199_v15 = vperm.slane %v2111_v41, 5  ;;  %s1349_s2 = sshll.u32 %s1719_s17, 4  ;;  %s1350_s2 = int_to_ptr.vmem [resolvable:$true] %s1349_s2 }
  0x3a   :  { %377 = vmatpush.msrb.mxu1 %v175_v39  ;;  %399 = vmatpush.msrb.mxu2 %v189_v40  ;;  %v173_v49 = vld [vmem:[%s3182_s0 + $0x2a8] sm:$0xff]  ;;  %v204_v53 = vld [vmem:[%s3182_s0 + $0x3a0] sm:$0xff]  ;;  %v186_v57 = vld [vmem:[%s3182_s0 + $0x310] sm:$0xff]  ;;  %s1720_s18 = smov [#allocation3]   ;;  %s1721_s21 = smov [#allocation7]  }
  0x3b   :  { %360 = vmatpush.msrb.mxu0 %v156_v42  ;;  %418 = vmatpush.msrb.mxu3 %v206_v43  ;;  %v153_v55 = vld [vmem:[%s3182_s0 + $0x208] sm:$0xff]  ;;  %v172_v56 = vld [vmem:[%s3182_s0 + $0x2a0] sm:$0xff]  ;;  %v203_v59 = vld [vmem:[%s3182_s0 + $0x398] sm:$0xff]  ;;  %s1360_s11 = sshll.u32 %s1721_s21, 4  ;;  %s1361_s11 = int_to_ptr.vmem [resolvable:$true] %s1360_s11 }
  0x3c   :  { %378 = vmatpush.msrb.mxu1 %v174_v44  ;;  %400 = vmatpush.msrb.mxu2 %v188_v45  ;;  %v152_v58 = vld [vmem:[%s3182_s0 + $0x200] sm:$0xff]  ;;  %v231_v61 = vld [vmem:[%s3182_s0 + $0x478] sm:$0xff]  ;;  %v185_v63 = vld [vmem:[%s3182_s0 + $0x308] sm:$0xff] }
  0x3d   :  { %361 = vmatpush.msrb.mxu0 %v155_v46  ;;  %419 = vmatpush.msrb.mxu3 %v205_v47  ;;  %v171_v62 = vld [vmem:[%s3182_s0 + $0x298] sm:$0xff]  ;;  %v230_v0 = vld [vmem:[%s3182_s0 + $0x470] sm:$0xff]  ;;  %v184_v3 = vld [vmem:[%s3182_s0 + $0x300] sm:$0xff] }
  0x3e   :  { %325 = vmatmul.f32.vlgmr.msra.gmra.mxu2 %v249_v48  ;;  %379 = vmatpush.msrb.mxu1 %v173_v49  ;;  %v202_v1 = vld [vmem:[%s3182_s0 + $0x390] sm:$0xff]  ;;  %v229_v4 = vld [vmem:[%s3182_s0 + $0x468] sm:$0xff]  ;;  %v228_v8 = vld [vmem:[%s3182_s0 + $0x460] sm:$0xff] }
  0x3f   :  { %362 = vmatpush.msrb.mxu0 %v154_v50  ;;  %401 = vmatpush.msrb.mxu2 %v187_v51  ;;  %v170_v2 = vld [vmem:[%s3182_s0 + $0x290] sm:$0xff]  ;;  %v201_v5 = vld [vmem:[%s3182_s0 + $0x388] sm:$0xff]  ;;  %v200_v9 = vld [vmem:[%s3182_s0 + $0x380] sm:$0xff] }
  0x40   :  { %420 = vmatpush.msrb.mxu3 %v204_v53  ;;  %285 = vmatmul.f32.vlgmr.msra.gmra.mxu0 %v247_v52  ;;  %v169_v7 = vld [vmem:[%s3182_s0 + $0x288] sm:$0xff]  ;;  %v227_v12 = vld [vmem:[%s3182_s0 + $0x458] sm:$0xff]  ;;  %v238_v13 = vld [vmem:[#allocation2] sm:$0x1] }
  0x41   :  { %363 = vmatpush.msrb.mxu0 %v153_v55  ;;  %345 = vmatmul.f32.vlgmr.msra.gmra.mxu3 %v250_v54  ;;  %v168_v14 = vld [vmem:[%s3182_s0 + $0x280] sm:$0xff]  ;;  %v226_v17 = vld [vmem:[%s3182_s0 + $0x450] sm:$0xff]  ;;  %v237_v18 = vld [vmem:[%s3182_s0 + $0x4a8] sm:$0xff] }
  0x42   :  { %380 = vmatpush.msrb.mxu1 %v172_v56  ;;  %402 = vmatpush.msrb.mxu2 %v186_v57  ;;  %v225_v19 = vld [vmem:[%s3182_s0 + $0x448] sm:$0xff]  ;;  %v236_v20 = vld [vmem:[%s3182_s0 + $0x4a0] sm:$0xff]  ;;  %v235_v22 = vld [vmem:[%s3182_s0 + $0x498] sm:$0xff] }
  0x43   :  { %364 = vmatpush.msrb.mxu0 %v152_v58  ;;  %421 = vmatpush.msrb.mxu3 %v203_v59  ;;  %v224_v21 = vld [vmem:[%s3182_s0 + $0x440] sm:$0xff]  ;;  %v223_v23 = vld [vmem:[%s3182_s0 + $0x438] sm:$0xff]  ;;  %v234_v25 = vld [vmem:[%s3182_s0 + $0x490] sm:$0xff] }
  0x44   :  { %305 = vmatmul.f32.vlgmr.msra.gmra.mxu1 %v248_v60  ;;  %403 = vmatpush.msrb.mxu2 %v185_v63  ;;  %v887_v24 = vld [vmem:[#allocation2] sm:$0x1]  ;;  %v222_v26 = vld [vmem:[%s3182_s0 + $0x430] sm:$0xff]  ;;  %v233_v27 = vld [vmem:[%s3182_s0 + $0x488] sm:$0xff] }
  0x45   :  { %429 = vmatpush.msra.mxu0 %v231_v61  ;;  %381 = vmatpush.msrb.mxu1 %v171_v62  ;;  %v221_v28 = vld [vmem:[%s3182_s0 + $0x428] sm:$0xff]  ;;  %v232_v31 = vld [vmem:[%s3182_s0 + $0x480] sm:$0xff]  ;;  %v219_v33 = vld [vmem:[%s3182_s0 + $0x418] sm:$0xff] }
  0x46   :  { %422 = vmatpush.msrb.mxu3 %v202_v1  ;;  %404 = vmatpush.msrb.mxu2 %v184_v3  ;;  %v2260_v29 = vld [vmem:[%s3183_s1 + $0x8] sm:$0x3]  ;;  %v220_v32 = vld [vmem:[%s3182_s0 + $0x420] sm:$0xff]  ;;  %v218_v34 = vld [vmem:[%s3182_s0 + $0x410] sm:$0xff]  ;;  %s1338_s1 = sshll.u32 %s1720_s18, 4  ;;  %s1339_s1 = int_to_ptr.vmem [resolvable:$true] %s1338_s1 }
  0x47   :  { %430 = vmatpush.msra.mxu0 %v230_v0  ;;  %382 = vmatpush.msrb.mxu1 %v170_v2  ;;  %v3197_v30 = vperm.slane %v2260_v29, 1  ;;  %v217_v35 = vld [vmem:[%s3182_s0 + $0x408] sm:$0xff]  ;;  %v216_v36 = vld [vmem:[%s3182_s0 + $0x400] sm:$0xff]  ;;  %v3196_v37 = vperm.slane %v2260_v29, 0  ;;  %v2304_v49 = vld [vmem:[%s3185_s3 + $0x58] sm:$0xff] }
  0x48   :  { %423 = vmatpush.msrb.mxu3 %v201_v5  ;;  %405 = vmatmul.f32.vlgmr.msrb.gmra.mxu2 %v253_v6  ;;  %v2290_v45 = vld [vmem:[%s3185_s3 + $0x60] sm:$0xf]  ;;  %v2309_v50 = vld [vmem:[%s3187_s5 + $0x58] sm:$0xff]  ;;  %v2316_v53 = vld [vmem:[%s3185_s3 + $0x50] sm:$0xff] }
  0x49   :  { %431 = vmatpush.msra.mxu0 %v229_v4  ;;  %383 = vmatpush.msrb.mxu1 %v169_v7  ;;  %v2295_v46 = vld [vmem:[%s3187_s5 + $0x60] sm:$0xf]  ;;  %v2321_v55 = vld [vmem:[%s3187_s5 + $0x50] sm:$0xff]  ;;  %v2328_v57 = vld [vmem:[%s3185_s3 + $0x48] sm:$0xff] }
  0x4a   :  { %424 = vmatpush.msrb.mxu3 %v200_v9  ;;  %1583 = vset.pattern.permute.xlu0 %v1718_v16  ;;  %v2333_v58 = vld [vmem:[%s3187_s5 + $0x48] sm:$0xff]  ;;  %v2340_v61 = vld [vmem:[%s3185_s3 + $0x40] sm:$0xff]  ;;  %v2352_v0 = vld [vmem:[%s3185_s3 + $0x38] sm:$0xff] }
  0x4b   :  { %432 = vmatpush.msra.mxu0 %v228_v8  ;;  %425 = vmatmul.f32.vlgmr.msrb.gmra.mxu3 %v3200_v11  ;;  %v2345_v62 = vld [vmem:[%s3187_s5 + $0x40] sm:$0xff]  ;;  %v2357_v1 = vld [vmem:[%s3187_s5 + $0x38] sm:$0xff]  ;;  %v2364_v3 = vld [vmem:[%s3185_s3 + $0x30] sm:$0xff] }
  0x4c   :  { %365 = vmatmul.f32.vlgmr.msrb.gmra.mxu0 %v3198_v10  ;;  %241 = vperm.xlu0 %1583, %v238_v13   ;;  %v2369_v4 = vld [vmem:[%s3187_s5 + $0x30] sm:$0xff]  ;;  %v2376_v7 = vld [vmem:[%s3185_s3 + $0x28] sm:$0xff]  ;;  %v2393_v13 = vld [vmem:[%s3187_s5 + $0x20] sm:$0xff] }
  0x4d   :  { %433 = vmatpush.msra.mxu0 %v227_v12  ;;  %384 = vmatpush.msrb.mxu1 %v168_v14  ;;  %v2381_v8 = vld [vmem:[%s3187_s5 + $0x28] sm:$0xff]  ;;  %v2388_v12 = vld [vmem:[%s3185_s3 + $0x20] sm:$0xff]  ;;  %v2400_v16 = vld [vmem:[%s3185_s3 + $0x18] sm:$0xff] }
  0x4e   :  { %385 = vmatmul.f32.vlgmr.msrb.gmra.mxu1 %v3199_v15  ;;  %1398 = vmatpush.msk.msra.mxu2 %vm493_vm1, %v2290_v45  ;;  %v1438_v10 = vld [vmem:[%s3182_s0 + $0x580] sm:$0xff] }
  0x4f   :  { %434 = vmatpush.msra.mxu0 %v226_v17  ;;  %459 = vmatpush.msra.mxu1 %v237_v18  ;;  %v2405_v17 = vld [vmem:[%s3187_s5 + $0x18] sm:$0xff]  ;;  %v2410_v18 = vld [vmem:[%s3185_s3 + $0x10] sm:$0xff] }
  0x50   :  { %1401 = vmatpush.msk.msra.mxu3 %vm493_vm1, %v2295_v46  ;;  %501 = vmatpush.msra.mxu2 %v2304_v49 }
  0x51   :  { %435 = vmatpush.msra.mxu0 %v225_v19  ;;  %460 = vmatpush.msra.mxu1 %v236_v20  ;;  %v2417_v19 = vld [vmem:[%s3187_s5 + $0x10] sm:$0xff] }
  0x52   :  { %544 = vmatpush.msra.mxu3 %v2309_v50  ;;  %502 = vmatpush.msra.mxu2 %v2316_v53 }
  0x53   :  { %436 = vmatpush.msra.mxu0 %v224_v21  ;;  %461 = vmatpush.msra.mxu1 %v235_v22  ;;  %v2422_v21 = vld [vmem:[%s3185_s3 + $0x8] sm:$0xff] }
  0x54   :  { %890 = vperm.xlu0 %1583, %v887_v24   ;;  %545 = vmatpush.msra.mxu3 %v2321_v55  ;;  %v2427_v22 = vld [vmem:[%s3187_s5 + $0x8] sm:$0xff]  ;;  %v2434_v24 = vld [vmem:[%s3185_s3] sm:$0xff] }
  0x55   :  { %437 = vmatpush.msra.mxu0 %v223_v23  ;;  %462 = vmatpush.msra.mxu1 %v234_v25  ;;  %v2439_v25 = vld [vmem:[%s3187_s5] sm:$0xff] }
  0x56   :  { %503 = vmatpush.msra.mxu2 %v2328_v57  ;;  %546 = vmatpush.msra.mxu3 %v2333_v58 }
  0x57   :  { %438 = vmatpush.msra.mxu0 %v222_v26  ;;  %463 = vmatpush.msra.mxu1 %v233_v27 }
  0x58   :  { %504 = vmatpush.msra.mxu2 %v2340_v61  ;;  %547 = vmatpush.msra.mxu3 %v2345_v62 }
  0x59   :  { %439 = vmatpush.msra.mxu0 %v221_v28  ;;  %464 = vmatpush.msra.mxu1 %v232_v31 }
  0x5a   :  { %1396 = vmatmul.msk.f32.vlgmr.msra.gmra.mxu1 %vm266_vm0, %v3197_v30  ;;  %505 = vmatpush.msra.mxu2 %v2352_v0 }
  0x5b   :  { %440 = vmatpush.msra.mxu0 %v220_v32  ;;  %548 = vmatpush.msra.mxu3 %v2357_v1 }
  0x5c   :  { %506 = vmatpush.msra.mxu2 %v2364_v3 }
  0x5d   :  { %441 = vmatpush.msra.mxu0 %v219_v33  ;;  %549 = vmatpush.msra.mxu3 %v2369_v4 }
  0x5e   :  { %507 = vmatpush.msra.mxu2 %v2376_v7 }
  0x5f   :  { %442 = vmatpush.msra.mxu0 %v218_v34  ;;  %550 = vmatpush.msra.mxu3 %v2381_v8 }
  0x60   :  { %508 = vmatpush.msra.mxu2 %v2388_v12 }
  0x61   :  { %443 = vmatpush.msra.mxu0 %v217_v35  ;;  %551 = vmatpush.msra.mxu3 %v2393_v13 }
  0x62   :  { %509 = vmatpush.msra.mxu2 %v2400_v16 }
  0x63   :  { %444 = vmatpush.msra.mxu0 %v216_v36  ;;  %552 = vmatpush.msra.mxu3 %v2405_v17 }
  0x64   :  { %445 = vmatmul.f32.vlgmr.msra.gmra.mxu0 %v3196_v37  ;;  %510 = vmatpush.msra.mxu2 %v2410_v18  ;;  %v1470_v37 = vld [vmem:[%s3182_s0 + $0x680] sm:$0xff] }
  0x65   :  { %553 = vmatpush.msra.mxu3 %v2417_v19 }
  0x66   :  { %511 = vmatpush.msra.mxu2 %v2422_v21 }
  0x67   :  { %554 = vmatpush.msra.mxu3 %v2427_v22 }
  0x68   :  { %512 = vmatpush.msra.mxu2 %v2434_v24 }
  0x69   :  { %555 = vmatpush.msra.mxu3 %v2439_v25 }
  0xbd   :  { %v286_v40 = vpop.f32.mrf.mxu0 }
  0xbe   :  { %v242_v38 = vpop.permute.xlu0 %241 }
  0xbf   :  { %v244_v39 = vperm.slane %v242_v38, 0 }
  0xc1   :  { %v287_v42 = vadd.f32 %v286_v40, %v244_v39  ;;  %v306_v43 = vpop.f32.mrf.mxu1  ;;  %v326_v47 = vpop.f32.mrf.mxu2 }
  0xc3   :  { %v307_v44 = vadd.f32 %v306_v43, %v287_v42 }
  0xc4   :  { %v346_v56 = vpop.f32.mrf.mxu3 }
  0xc5   :  { %v327_v51 = vadd.f32 %v326_v47, %v307_v44 }
  0xc7   :  { %v347_v59 = vadd.f32 %v346_v56, %v327_v51 }
  0xc9   :  { %v366_v63 = vpop.f32.mrf.mxu0 }
  0xca   :  { %v367_v2 = vadd.f32 %v366_v63, %v347_v59  ;;  %v488_v59 = vld [vmem:[%s3186_s4] sm:$0x1] }
  0xcb   :  { %v386_v5 = vpop.f32.mrf.mxu1  ;;  %v406_v14 = vpop.f32.mrf.mxu2  ;;  %v536_v63 = vld [vmem:[%s3188_s6] sm:$0x1] }
  0xcc   :  { %v387_v9 = vadd.f32 %v386_v5, %v367_v2 }
  0xce   :  { %v407_v20 = vadd.f32 %v406_v14, %v387_v9  ;;  %v426_v23 = vpop.f32.mrf.mxu3  ;;  %v2456_v9 = vld [vmem:[%s3190_s8 + $0x60] sm:$0x3f] }
  0xcf   :  { %1404 = vmatpush.msk.msrb.mxu1 %vm3202_vm7, %v2456_v9 }
  0xd0   :  { %v427_v26 = vadd.f32 %v426_v23, %v407_v20  ;;  %v2463_v23 = vld [vmem:[%s3190_s8 + $0x40] sm:$0xff] }
  0xd1   :  { %625 = vmatpush.msrb.mxu1 %v2463_v23 }
  0xd7   :  { %v466_v28 = vpop.f32.mrf.mxu1 }
  0xe1   :  { %v446_v27 = vpop.f32.mrf.mxu0 }
  0xe2   :  { %v447_v31 = vadd.f32 %v446_v27, %v427_v26 }
  0xe4   :  { %v467_v32 = vadd.f32 %v466_v28, %v447_v31  ;;  %v2469_v28 = vld [vmem:[%s3190_s8 + $0x20] sm:$0xff]  ;;  %v86_v31 = vld [vmem:[%s3190_s8 + $0x70] sm:$0x3f] }
  0xe5   :  { %626 = vmatpush.msrb.mxu1 %v2469_v28  ;;  %1408 = vmatpush.msk.msrb.mxu2 %vm3202_vm7, %v86_v31  ;;  %v1442_v31 = vld [vmem:[%s3182_s0 + $0x5a0] sm:$0xff] }
  0xe6   :  { %v1397_v33 = vmul.f32 -1.442695, %v467_v32  ;;  %v2477_v32 = vld [vmem:[%s3190_s8] sm:$0xff] }
  0xe7   :  { %627 = vmatpush.msrb.mxu1 %v2477_v32 }
  0xe8   :  { %1584 = vpow2.f32 %v1397_v33  ;;  %v2484_v33 = vld [vmem:[%s3190_s8 + $0x68] sm:$0x3f] }
  0xe9   :  { %1406 = vmatpush.msk.msra.mxu1 %vm3202_vm7, %v2484_v33 }
  0xee   :  { %v1585_v34 = vpop.eup %1584 }
  0xef   :  { %v472_v35 = vadd.f32 1.0, %v1585_v34  ;;  %v82_v34 = vld [vmem:[%s3190_s8 + $0x50] sm:$0xff] }
  0xf0   :  { %665 = vmatpush.msrb.mxu2 %v82_v34  ;;  %v1456_v34 = vld [vmem:[%s3182_s0 + $0x610] sm:$0xff] }
  0xf1   :  { %1586 = vrcp.f32 %v472_v35  ;;  %v484_v40 = vand.u32 2147483648, %v472_v35  ;;  %v482_v43 = vand.u32 2147483647, %v472_v35  ;;  %vm478_vm3 = vweird.f32 %v472_v35 }
  0xf3   :  { %v485_v47 = vor.u32 1.1754944e-38, %v484_v40  ;;  %vm483_vm6 = vcmp.eq.f32.partialorder %v482_v43, 8.507059e+37  ;;  %v2513_v40 = vld [vmem:[%s3190_s8 + $0x38] sm:$0xff]  ;;  %v2524_v43 = vld [vmem:[%s3190_s8 + $0x28] sm:$0xff] }
  0xf7   :  { %v1587_v36 = vpop.eup %1586 }
  0xf8   :  { %v474_v38 = vmul.f32 %v1587_v36, %v472_v35  ;;  %vm479_vm2 = vweird.f32 %v1587_v36  ;;  %v2492_v35 = vld [vmem:[%s3190_s8 + $0x78] sm:$0x3f] }
  0xf9   :  { %vm480_vm4 = vmor %vm478_vm3, %vm479_vm2  ;;  %1410 = vmatpush.msk.msrb.mxu3 %vm3202_vm7, %v2492_v35  ;;  %vm595_vm3 = vcmask 244736  }
  0xfa   :  { %v475_v39 = vsub.f32 1.0, %v474_v38  ;;  %v2502_v38 = vld [vmem:[%s3190_s8 + $0x58] sm:$0xff] }
  0xfb   :  { %685 = vmatpush.msrb.mxu3 %v2502_v38 }
  0xfc   :  { %v476_v42 = vmul.f32 %v1587_v36, %v475_v39  ;;  %v2508_v39 = vld [vmem:[%s3190_s8 + $0x48] sm:$0xff] }
  0xfd   :  { %645 = vmatpush.msra.mxu1 %v2508_v39  ;;  %686 = vmatpush.msrb.mxu3 %v2513_v40 }
  0xfe   :  { %v477_v44 = vadd.f32 %v1587_v36, %v476_v42  ;;  %v74_v42 = vld [vmem:[%s3190_s8 + $0x10] sm:$0xff] }
  0xff   :  { %646 = vmatpush.msra.mxu1 %v2524_v43 }
 0x100   :  { %v481_v51 = vsel %vm480_vm4, %v1587_v36, %v477_v44  ;;  %v78_v36 = vld [vmem:[%s3190_s8 + $0x30] sm:$0xff]  ;;  %v1459_v44 = vld [vmem:[%s3182_s0 + $0x628] sm:$0xff]  ;;  %vm3201_vm4 = vcmask 1041409  }
 0x101   :  { %v486_v56 = vsel %vm483_vm6, %v485_v47, %v481_v51  ;;  %666 = vmatpush.msrb.mxu2 %v78_v36  ;;  %v2534_v47 = vld [vmem:[%s3190_s8 + $0x18] sm:$0xff]  ;;  %vm722_vm6 = vsmask.f32 1280 }
 0x102   :  { %1399 = vmatmul.msk.f32.vlgmr.msra.gmra.mxu2 %vm489_vm5, %v486_v56  ;;  %1402 = vmatmul.msk.f32.vlgmr.msra.gmra.mxu3 %vm489_vm5, %v486_v56  ;;  %v2539_v56 = vld [vmem:[%s3190_s8 + $0x8] sm:$0xff]  ;;  %v1473_v36 = vld [vmem:[%s3182_s0 + $0x698] sm:$0xff] }
 0x103   :  { %667 = vmatpush.msrb.mxu2 %v74_v42  ;;  %687 = vmatpush.msrb.mxu3 %v2534_v47 }
 0x104   :  { %647 = vmatpush.msra.mxu1 %v2539_v56 }
 0x105   :  { %934 = vmatpush.msra.mxu2 %v1459_v44 }
 0x185   :  { %v514_v2 = vpop.f32.mrf.mxu2  ;;  %v557_v5 = vpop.f32.mrf.mxu3 }
 0x186   :  { %v515_v14 = vadd.f32 %v514_v2, %v488_v59  ;;  %v558_v20 = vadd.f32 %v557_v5, %v536_v63  ;;  %v1458_v5 = vld [vmem:[%s3182_s0 + $0x620] sm:$0xff] }
 0x187   :  { %935 = vmatpush.msra.mxu2 %v1458_v5  ;;  %v1455_v5 = vld [vmem:[%s3182_s0 + $0x608] sm:$0xff] }
 0x188   :  { %v1400_v26 = vmul.f32 -1.442695, %v515_v14  ;;  %v1403_v27 = vmul.f32 -1.442695, %v558_v20  ;;  %v1475_v14 = vld [vmem:[%s3182_s0 + $0x6a8] sm:$0xff] }
 0x189   :  { %954 = vmatpush.msra.mxu3 %v1475_v14  ;;  %v1443_v20 = vld [vmem:[%s3182_s0 + $0x5a8] sm:$0xff]  ;;  %v1472_v14 = vld [vmem:[%s3182_s0 + $0x690] sm:$0xff] }
 0x18a   :  { %1588 = vpow2.f32 %v1400_v26  ;;  %v1457_v26 = vld [vmem:[%s3182_s0 + $0x618] sm:$0xff]  ;;  %914 = vmatpush.msrb.mxu0 %v1443_v20 }
 0x18b   :  { %1590 = vpow2.f32 %v1403_v27  ;;  %v1474_v27 = vld [vmem:[%s3182_s0 + $0x6a0] sm:$0xff]  ;;  %936 = vmatpush.msra.mxu2 %v1457_v26 }
 0x18c   :  { %955 = vmatpush.msra.mxu3 %v1474_v27  ;;  %915 = vmatpush.msrb.mxu0 %v1442_v31  ;;  %v1440_v27 = vld [vmem:[%s3182_s0 + $0x590] sm:$0xff] }
 0x18d   :  { %937 = vmatpush.msra.mxu2 %v1456_v34 }
 0x18e   :  { %956 = vmatpush.msra.mxu3 %v1473_v36  ;;  %v1454_v36 = vld [vmem:[%s3182_s0 + $0x600] sm:$0xff] }
 0x18f   :  { %938 = vmatpush.msra.mxu2 %v1455_v5 }
 0x190   :  { %v1589_v51 = vpop.eup %1588  ;;  %957 = vmatpush.msra.mxu3 %v1472_v14 }
 0x191   :  { %v1591_v59 = vpop.eup %1590  ;;  %v2541_v63 = vadd.f32 1.0, %v1589_v51  ;;  %939 = vmatpush.msra.mxu2 %v1454_v36 }
 0x192   :  { %v2544_v2 = vadd.f32 1.0, %v1591_v59  ;;  %v1441_v59 = vld [vmem:[%s3182_s0 + $0x598] sm:$0xff] }
 0x193   :  { %1592 = vrcp.f32 %v2541_v63  ;;  %916 = vmatpush.msrb.mxu0 %v1441_v59  ;;  %vm526_vm9 = vweird.f32 %v2541_v63  ;;  %v532_v31 = vand.u32 2147483648, %v2541_v63  ;;  %v530_v14 = vand.u32 2147483647, %v2541_v63 }
 0x194   :  { %1594 = vrcp.f32 %v2544_v2  ;;  %v575_v5 = vand.u32 2147483648, %v2544_v2  ;;  %vm569_vm12 = vweird.f32 %v2544_v2 }
 0x195   :  { %917 = vmatpush.msrb.mxu0 %v1440_v27  ;;  %v1453_v27 = vld [vmem:[%s3182_s0 + $0x5f8] sm:$0xff]  ;;  %v533_v15 = vor.u32 1.1754944e-38, %v532_v31  ;;  %vm531_vm15 = vcmp.eq.f32.partialorder %v530_v14, 8.507059e+37  ;;  %v1451_v31 = vld [vmem:[%s3182_s0 + $0x5e8] sm:$0xff]  ;;  %v1436_v14 = vld [vmem:[%s3182_s0 + $0x570] sm:$0xff] }
 0x196   :  { %940 = vmatpush.msra.mxu2 %v1453_v27  ;;  %v1450_v27 = vld [vmem:[%s3182_s0 + $0x5e0] sm:$0xff] }
 0x199   :  { %v1593_v42 = vpop.eup %1592 }
 0x19a   :  { %v1595_v44 = vpop.eup %1594  ;;  %v522_v51 = vmul.f32 %v1593_v42, %v2541_v63  ;;  %vm527_vm8 = vweird.f32 %v1593_v42  ;;  %v1452_v63 = vld [vmem:[%s3182_s0 + $0x5f0] sm:$0xff] }
 0x19b   :  { %v565_v20 = vmul.f32 %v1595_v44, %v2544_v2  ;;  %vm570_vm10 = vweird.f32 %v1595_v44  ;;  %vm2610_vm11 = vmor %vm526_vm9, %vm527_vm8  ;;  %941 = vmatpush.msra.mxu2 %v1452_v63  ;;  %v1434_v63 = vld [vmem:[%s3182_s0 + $0x560] sm:$0xff] }
 0x19c   :  { %v523_v26 = vsub.f32 1.0, %v522_v51  ;;  %v1471_v51 = vld [vmem:[%s3182_s0 + $0x688] sm:$0xff]  ;;  %vm2626_vm13 = vmor %vm569_vm12, %vm570_vm10  ;;  %vm711_vm10 = vcmask 1042434  }
 0x19d   :  { %v566_v34 = vsub.f32 1.0, %v565_v20  ;;  %958 = vmatpush.msra.mxu3 %v1471_v51  ;;  %v1439_v20 = vld [vmem:[%s3182_s0 + $0x588] sm:$0xff]  ;;  %v573_v51 = vand.u32 2147483647, %v2544_v2  ;;  %942 = vmatpush.msra.mxu2 %v1451_v31  ;;  %v1465_v2 = vld [vmem:[%s3182_s0 + $0x658] sm:$0xff]  ;;  %v1432_v31 = vld [vmem:[%s3182_s0 + $0x550] sm:$0xff] }
 0x19e   :  { %v524_v59 = vmul.f32 %v1593_v42, %v523_v26  ;;  %918 = vmatpush.msrb.mxu0 %v1439_v20  ;;  %v1437_v20 = vld [vmem:[%s3182_s0 + $0x578] sm:$0xff]  ;;  %v1467_v26 = vld [vmem:[%s3182_s0 + $0x668] sm:$0xff]  ;;  %vm3104_vm9 = vmand %vm3201_vm4, %vm722_vm6  ;;  %vm715_vm4 = vcmask 1041408  }
 0x19f   :  { %v567_v36 = vmul.f32 %v1595_v44, %v566_v34  ;;  %959 = vmatpush.msra.mxu3 %v1470_v37  ;;  %v1469_v34 = vld [vmem:[%s3182_s0 + $0x678] sm:$0xff]  ;;  %v576_v37 = vor.u32 1.1754944e-38, %v575_v5  ;;  %vm574_vm2 = vcmp.eq.f32.partialorder %v573_v51, 8.507059e+37  ;;  %943 = vmatpush.msra.mxu2 %v1450_v27 }
 0x1a0   :  { %v525_v30 = vadd.f32 %v1593_v42, %v524_v59  ;;  %919 = vmatpush.msrb.mxu0 %v1438_v10  ;;  %v1468_v10 = vld [vmem:[%s3182_s0 + $0x670] sm:$0xff]  ;;  %v1445_v27 = vld [vmem:[%s3182_s0 + $0x5b8] sm:$0xff] }
 0x1a1   :  { %v568_v11 = vadd.f32 %v1595_v44, %v567_v36  ;;  %960 = vmatpush.msra.mxu3 %v1469_v34  ;;  %v1466_v36 = vld [vmem:[%s3182_s0 + $0x660] sm:$0xff]  ;;  %v1448_v34 = vld [vmem:[%s3182_s0 + $0x5d0] sm:$0xff] }
 0x1a2   :  { %v529_v59 = vsel %vm2610_vm11, %v1593_v42, %v525_v30  ;;  %920 = vmatpush.msrb.mxu0 %v1437_v20  ;;  %v1464_v20 = vld [vmem:[%s3182_s0 + $0x650] sm:$0xff]  ;;  %vm726_vm11 = vsmask.f32 2304 }
 0x1a3   :  { %v572_v5 = vsel %vm2626_vm13, %v1595_v44, %v568_v11  ;;  %v534_v30 = vsel %vm531_vm15, %v533_v15, %v529_v59  ;;  %961 = vmatpush.msra.mxu3 %v1468_v10  ;;  %v1435_v15 = vld [vmem:[%s3182_s0 + $0x568] sm:$0xff]  ;;  %v1449_v44 = vld [vmem:[%s3182_s0 + $0x5d8] sm:$0xff]  ;;  %v1446_v10 = vld [vmem:[%s3182_s0 + $0x5c0] sm:$0xff]  ;;  %vm729_vm15 = vcmask 125955  }
 0x1a4   :  { %v577_v42 = vsel %vm574_vm2, %v576_v37, %v572_v5  ;;  %697 = vst.msk [vmem:[#allocation3] sm:$0x1] %vm696_vm14, %v534_v30  ;;  %921 = vmatpush.msrb.mxu0 %v1436_v14  ;;  %944 = vmatpush.msra.mxu2 %v1449_v44  ;;  %v1433_v37 = vld [vmem:[%s3182_s0 + $0x558] sm:$0xff]  ;;  %v1447_v59 = vld [vmem:[%s3182_s0 + $0x5c8] sm:$0xff]  ;;  %v1430_v44 = vld [vmem:[%s3182_s0 + $0x540] sm:$0xff] }
 0x1a5   :  { %v580_v11 = vmul.f32 0.5, %v577_v42  ;;  %698 = vst.msk [vmem:[#allocation5] sm:$0x1] %vm696_vm14, %v577_v42  ;;  %962 = vmatpush.msra.mxu3 %v1467_v26  ;;  %v1463_v5 = vld [vmem:[%s3182_s0 + $0x648] sm:$0xff]  ;;  %v579_v42 = vld [vmem:[%s3189_s7] sm:$0x1]  ;;  %vm727_vm13 = vmand %vm711_vm10, %vm726_vm11 }
 0x1a6   :  { %922 = vmatpush.msrb.mxu0 %v1435_v15  ;;  %945 = vmatpush.msra.mxu2 %v1448_v34  ;;  %v1431_v14 = vld [vmem:[%s3182_s0 + $0x548] sm:$0xff]  ;;  %v1462_v26 = vld [vmem:[%s3182_s0 + $0x640] sm:$0xff]  ;;  %vm730_vm2 = vsmask.f32 3328 }
 0x1a7   :  { %v581_v51 = vmul.f32 1.442695, %v580_v11  ;;  %963 = vmatpush.msra.mxu3 %v1466_v36  ;;  %v1444_v36 = vld [vmem:[%s3182_s0 + $0x5b0] sm:$0xff]  ;;  %v1427_v34 = vld [vmem:[%s3182_s0 + $0x528] sm:$0xff]  ;;  %vm731_vm6 = vmand %vm729_vm15, %vm730_vm2 }
 0x1a8   :  { %923 = vmatpush.msrb.mxu0 %v1434_v63  ;;  %946 = vmatpush.msra.mxu2 %v1447_v59  ;;  %v1460_v59 = vld [vmem:[%s3182_s0 + $0x630] sm:$0xff] }
 0x1a9   :  { %1596 = vpow2.f32 %v581_v51  ;;  %964 = vmatpush.msra.mxu3 %v1465_v2  ;;  %v1461_v51 = vld [vmem:[%s3182_s0 + $0x638] sm:$0xff] }
 0x1aa   :  { %924 = vmatpush.msrb.mxu0 %v1433_v37  ;;  %947 = vmatpush.msra.mxu2 %v1446_v10  ;;  %v1429_v2 = vld [vmem:[%s3182_s0 + $0x538] sm:$0xff]  ;;  %v1523_v37 = vld [vmem:[%s3182_s0 + $0x828] sm:$0xff]  ;;  %v1428_v10 = vld [vmem:[%s3182_s0 + $0x530] sm:$0xff] }
 0x1ab   :  { %965 = vmatpush.msra.mxu3 %v1464_v20  ;;  %v1539_v20 = vld [vmem:[%s3182_s0 + $0x8a8] sm:$0xff] }
 0x1ac   :  { %925 = vmatpush.msrb.mxu0 %v1432_v31  ;;  %948 = vmatpush.msra.mxu2 %v1445_v27  ;;  %v1522_v31 = vld [vmem:[%s3182_s0 + $0x820] sm:$0xff]  ;;  %v1424_v27 = vld [vmem:[%s3182_s0 + $0x510] sm:$0xff] }
 0x1ad   :  { %966 = vmatpush.msra.mxu3 %v1463_v5  ;;  %v1425_v5 = vld [vmem:[%s3182_s0 + $0x518] sm:$0xff] }
 0x1ae   :  { %926 = vmatpush.msrb.mxu0 %v1431_v14  ;;  %949 = vmatpush.msra.mxu2 %v1444_v36  ;;  %v1521_v14 = vld [vmem:[%s3182_s0 + $0x818] sm:$0xff] }
 0x1af   :  { %v1597_v11 = vpop.eup %1596  ;;  %967 = vmatpush.msra.mxu3 %v1462_v26  ;;  %v1538_v26 = vld [vmem:[%s3182_s0 + $0x8a0] sm:$0xff]  ;;  %v1537_v36 = vld [vmem:[%s3182_s0 + $0x898] sm:$0xff] }
 0x1b0   :  { %v583_v15 = vmul.f32 %v1597_v11, %v579_v42  ;;  %927 = vmatpush.msrb.mxu0 %v1430_v44  ;;  %v1507_v42 = vld [vmem:[%s3182_s0 + $0x7a8] sm:$0xff]  ;;  %v1520_v44 = vld [vmem:[%s3182_s0 + $0x810] sm:$0xff] }
 0x1b1   :  { %968 = vmatpush.msra.mxu3 %v1461_v51  ;;  %v1423_v11 = vld [vmem:[%s3182_s0 + $0x508] sm:$0xff]  ;;  %v1505_v51 = vld [vmem:[%s3182_s0 + $0x798] sm:$0xff] }
 0x1b2   :  { %v584_v63 = vadd.f32 %v583_v15, %v534_v30  ;;  %928 = vmatpush.msrb.mxu0 %v1429_v2  ;;  %v1426_v30 = vld [vmem:[%s3182_s0 + $0x520] sm:$0xff] }
 0x1b3   :  { %969 = vmatpush.msra.mxu3 %v1460_v59  ;;  %v1506_v15 = vld [vmem:[%s3182_s0 + $0x7a0] sm:$0xff]  ;;  %v1535_v59 = vld [vmem:[%s3182_s0 + $0x888] sm:$0xff] }
 0x1b4   :  { %1405 = vmatmul.msk.f32.vlgmr.msrb.gmra.mxu1 %vm595_vm3, %v584_v63  ;;  %1409 = vmatmul.msk.f32.vlgmr.msrb.gmra.mxu2 %vm595_vm3, %v584_v63  ;;  %699 = vst.msk [vmem:[#allocation7] sm:$0x1] %vm696_vm14, %v584_v63  ;;  %v1518_v2 = vld [vmem:[%s3182_s0 + $0x800] sm:$0xff] }
 0x1b5   :  { %1411 = vmatmul.msk.f32.vlgmr.msrb.gmra.mxu3 %vm595_vm3, %v584_v63  ;;  %894 = vmatpush.msrb.mxu1 %v1427_v34  ;;  %v1536_v34 = vld [vmem:[%s3182_s0 + $0x890] sm:$0xff] }
 0x1b6   :  { %1014 = vmatpush.msrb.mxu2 %v1523_v37  ;;  %1034 = vmatpush.msrb.mxu3 %v1539_v20  ;;  %v1420_v37 = vld [vmem:[%s3182_s0 + $0x4f0] sm:$0xff]  ;;  %v1517_v20 = vld [vmem:[%s3182_s0 + $0x7f8] sm:$0xff] }
 0x1b7   :  { %895 = vmatpush.msrb.mxu1 %v1426_v30  ;;  %929 = vmatpush.msrb.mxu0 %v1428_v10  ;;  %v1503_v30 = vld [vmem:[%s3182_s0 + $0x788] sm:$0xff]  ;;  %v1534_v10 = vld [vmem:[%s3182_s0 + $0x880] sm:$0xff] }
 0x1b8   :  { %1015 = vmatpush.msrb.mxu2 %v1522_v31  ;;  %930 = vmatmul.f32.vlgmr.msrb.gmra.mxu0 %v248_v60  ;;  %v1422_v60 = vld [vmem:[%s3182_s0 + $0x500] sm:$0xff]  ;;  %v1419_v31 = vld [vmem:[%s3182_s0 + $0x4e8] sm:$0xff] }
 0x1b9   :  { %896 = vmatpush.msrb.mxu1 %v1425_v5  ;;  %994 = vmatpush.msra.mxu0 %v1507_v42  ;;  %v1502_v5 = vld [vmem:[%s3182_s0 + $0x780] sm:$0xff]  ;;  %v1516_v42 = vld [vmem:[%s3182_s0 + $0x7f0] sm:$0xff] }
 0x1ba   :  { %1016 = vmatpush.msrb.mxu2 %v1521_v14  ;;  %1035 = vmatpush.msrb.mxu3 %v1538_v26  ;;  %v1418_v14 = vld [vmem:[%s3182_s0 + $0x4e0] sm:$0xff]  ;;  %v1501_v26 = vld [vmem:[%s3182_s0 + $0x778] sm:$0xff] }
 0x1bb   :  { %897 = vmatpush.msrb.mxu1 %v1424_v27  ;;  %995 = vmatpush.msra.mxu0 %v1506_v15  ;;  %v1533_v27 = vld [vmem:[%s3182_s0 + $0x878] sm:$0xff] }
 0x1bc   :  { %1407 = vmatmul.msk.f32.vlgmr.msra.gmra.mxu1 %vm595_vm3, %v584_v63  ;;  %950 = vmatmul.f32.vlgmr.msra.gmra.mxu2 %v249_v48  ;;  %v1519_v63 = vld [vmem:[%s3182_s0 + $0x808] sm:$0xff]  ;;  %v1421_v48 = vld [vmem:[%s3182_s0 + $0x4f8] sm:$0xff] }
 0x1bd   :  { %898 = vmatpush.msrb.mxu1 %v1423_v11  ;;  %970 = vmatmul.f32.vlgmr.msra.gmra.mxu3 %v250_v54  ;;  %v1504_v54 = vld [vmem:[%s3182_s0 + $0x790] sm:$0xff]  ;;  %v1515_v11 = vld [vmem:[%s3182_s0 + $0x7e8] sm:$0xff]  ;;  %v1417_v15 = vld [vmem:[%s3182_s0 + $0x4d8] sm:$0xff] }
 0x1be   :  { %1017 = vmatpush.msrb.mxu2 %v1520_v44  ;;  %1036 = vmatpush.msrb.mxu3 %v1537_v36  ;;  %v1532_v44 = vld [vmem:[%s3182_s0 + $0x870] sm:$0xff]  ;;  %v1514_v36 = vld [vmem:[%s3182_s0 + $0x7e0] sm:$0xff] }
 0x1bf   :  { %899 = vmatpush.msrb.mxu1 %v1422_v60  ;;  %996 = vmatpush.msra.mxu0 %v1505_v51  ;;  %v1500_v60 = vld [vmem:[%s3182_s0 + $0x770] sm:$0xff] }
 0x1c0   :  { %1018 = vmatpush.msrb.mxu2 %v1519_v63  ;;  %1037 = vmatpush.msrb.mxu3 %v1536_v34  ;;  %v1416_v51 = vld [vmem:[%s3182_s0 + $0x4d0] sm:$0xff]  ;;  %v1531_v63 = vld [vmem:[%s3182_s0 + $0x868] sm:$0xff]  ;;  %v1513_v34 = vld [vmem:[%s3182_s0 + $0x7d8] sm:$0xff] }
 0x1c1   :  { %900 = vmatpush.msrb.mxu1 %v1421_v48  ;;  %997 = vmatpush.msra.mxu0 %v1504_v54  ;;  %v1499_v48 = vld [vmem:[%s3182_s0 + $0x768] sm:$0xff] }
 0x1c2   :  { %1019 = vmatpush.msrb.mxu2 %v1518_v2  ;;  %1038 = vmatpush.msrb.mxu3 %v1535_v59  ;;  %v1415_v54 = vld [vmem:[%s3182_s0 + $0x4c8] sm:$0xff]  ;;  %v1530_v2 = vld [vmem:[%s3182_s0 + $0x860] sm:$0xff]  ;;  %v1512_v59 = vld [vmem:[%s3182_s0 + $0x7d0] sm:$0xff] }
 0x1c3   :  { %901 = vmatpush.msrb.mxu1 %v1420_v37  ;;  %998 = vmatpush.msra.mxu0 %v1503_v30  ;;  %v1498_v37 = vld [vmem:[%s3182_s0 + $0x760] sm:$0xff] }
 0x1c4   :  { %1020 = vmatpush.msrb.mxu2 %v1517_v20  ;;  %1039 = vmatpush.msrb.mxu3 %v1534_v10  ;;  %v1414_v30 = vld [vmem:[%s3182_s0 + $0x4c0] sm:$0xff]  ;;  %v1529_v20 = vld [vmem:[%s3182_s0 + $0x858] sm:$0xff]  ;;  %v1511_v10 = vld [vmem:[%s3182_s0 + $0x7c8] sm:$0xff] }
 0x1c5   :  { %902 = vmatpush.msrb.mxu1 %v1419_v31  ;;  %999 = vmatpush.msra.mxu0 %v1502_v5  ;;  %v1497_v31 = vld [vmem:[%s3182_s0 + $0x758] sm:$0xff] }
 0x1c6   :  { %1021 = vmatpush.msrb.mxu2 %v1516_v42  ;;  %1040 = vmatpush.msrb.mxu3 %v1533_v27  ;;  %v1413_v5 = vld [vmem:[%s3182_s0 + $0x4b8] sm:$0xff]  ;;  %v1528_v42 = vld [vmem:[%s3182_s0 + $0x850] sm:$0xff]  ;;  %v1510_v27 = vld [vmem:[%s3182_s0 + $0x7c0] sm:$0xff] }
 0x1c7   :  { %903 = vmatpush.msrb.mxu1 %v1418_v14  ;;  %1000 = vmatpush.msra.mxu0 %v1501_v26  ;;  %v1496_v14 = vld [vmem:[%s3182_s0 + $0x750] sm:$0xff] }
 0x1c8   :  { %1022 = vmatpush.msrb.mxu2 %v1515_v11  ;;  %1041 = vmatpush.msrb.mxu3 %v1532_v44  ;;  %v1412_v26 = vld [vmem:[%s3182_s0 + $0x4b0] sm:$0xff]  ;;  %v1527_v11 = vld [vmem:[%s3182_s0 + $0x848] sm:$0xff] }
 0x1c9   :  { %904 = vmatpush.msrb.mxu1 %v1417_v15  ;;  %1001 = vmatpush.msra.mxu0 %v1500_v60  ;;  %v1495_v15 = vld [vmem:[%s3182_s0 + $0x748] sm:$0xff]  ;;  %v1509_v60 = vld [vmem:[%s3182_s0 + $0x7b8] sm:$0xff] }
 0x1ca   :  { %1023 = vmatpush.msrb.mxu2 %v1514_v36  ;;  %1042 = vmatpush.msrb.mxu3 %v1531_v63  ;;  %v1491_v44 = vld [vmem:[%s3182_s0 + $0x728] sm:$0xff]  ;;  %v1526_v36 = vld [vmem:[%s3182_s0 + $0x840] sm:$0xff] }
 0x1cb   :  { %905 = vmatpush.msrb.mxu1 %v1416_v51  ;;  %1002 = vmatpush.msra.mxu0 %v1499_v48  ;;  %v1494_v51 = vld [vmem:[%s3182_s0 + $0x740] sm:$0xff]  ;;  %v1508_v48 = vld [vmem:[%s3182_s0 + $0x7b0] sm:$0xff] }
 0x1cc   :  { %1024 = vmatpush.msrb.mxu2 %v1513_v34  ;;  %1043 = vmatpush.msrb.mxu3 %v1530_v2  ;;  %v1490_v63 = vld [vmem:[%s3182_s0 + $0x720] sm:$0xff]  ;;  %v1525_v34 = vld [vmem:[%s3182_s0 + $0x838] sm:$0xff]  ;;  %v1524_v2 = vld [vmem:[%s3182_s0 + $0x830] sm:$0xff] }
 0x1cd   :  { %906 = vmatpush.msrb.mxu1 %v1415_v54  ;;  %1003 = vmatpush.msra.mxu0 %v1498_v37  ;;  %v1489_v54 = vld [vmem:[%s3182_s0 + $0x718] sm:$0xff]  ;;  %v1488_v37 = vld [vmem:[%s3182_s0 + $0x710] sm:$0xff] }
 0x1ce   :  { %1025 = vmatpush.msrb.mxu2 %v1512_v59  ;;  %1044 = vmatpush.msrb.mxu3 %v1529_v20  ;;  %v1492_v59 = vld [vmem:[%s3182_s0 + $0x730] sm:$0xff]  ;;  %v3207_v20 = vperm.slane %v2111_v41, 7 }
 0x1cf   :  { %907 = vmatpush.msrb.mxu1 %v1414_v30  ;;  %1004 = vmatpush.msra.mxu0 %v1497_v31  ;;  %v1487_v30 = vld [vmem:[%s3182_s0 + $0x708] sm:$0xff]  ;;  %v3208_v31 = vperm.slane %v2111_v41, 5 }
 0x1d0   :  { %1026 = vmatpush.msrb.mxu2 %v1511_v10  ;;  %1045 = vmatpush.msrb.mxu3 %v1528_v42  ;;  %v1484_v10 = vld [vmem:[%s3182_s0 + $0x6f0] sm:$0xff] }
 0x1d1   :  { %908 = vmatpush.msrb.mxu1 %v1413_v5  ;;  %1005 = vmatpush.msra.mxu0 %v1496_v14 }
 0x1d2   :  { %1027 = vmatpush.msrb.mxu2 %v1510_v27  ;;  %1046 = vmatpush.msrb.mxu3 %v1527_v11 }
 0x1d3   :  { %909 = vmatpush.msrb.mxu1 %v1412_v26  ;;  %1006 = vmatpush.msra.mxu0 %v1495_v15 }
 0x1d4   :  { %910 = vmatmul.f32.vlgmr.msrb.gmra.mxu1 %v247_v52  ;;  %1028 = vmatpush.msrb.mxu2 %v1509_v60  ;;  %v1493_v52 = vld [vmem:[%s3182_s0 + $0x738] sm:$0xff] }
 0x1d5   :  { %974 = vmatpush.msra.mxu1 %v1491_v44  ;;  %1047 = vmatpush.msrb.mxu3 %v1526_v36 }
 0x1d6   :  { %1007 = vmatpush.msra.mxu0 %v1494_v51  ;;  %1029 = vmatpush.msrb.mxu2 %v1508_v48 }
 0x1d7   :  { %975 = vmatpush.msra.mxu1 %v1490_v63  ;;  %1048 = vmatpush.msrb.mxu3 %v1525_v34 }
 0x1d8   :  { %1030 = vmatmul.f32.vlgmr.msrb.gmra.mxu2 %v253_v6  ;;  %1008 = vmatpush.msra.mxu0 %v1493_v52  ;;  %v1486_v6 = vld [vmem:[%s3182_s0 + $0x700] sm:$0xff] }
 0x1d9   :  { %976 = vmatpush.msra.mxu1 %v1489_v54  ;;  %1049 = vmatpush.msrb.mxu3 %v1524_v2 }
 0x1da   :  { %1564 = vmatpush.msk.msra.mxu2 %vm493_vm1, %v2290_v45  ;;  %1050 = vmatmul.f32.vlgmr.msrb.gmra.mxu3 %v3207_v20  ;;  %v1485_v45 = vld [vmem:[%s3182_s0 + $0x6f8] sm:$0xff] }
 0x1db   :  { %977 = vmatpush.msra.mxu1 %v1488_v37  ;;  %1009 = vmatpush.msra.mxu0 %v1492_v59  ;;  %v733_v59 = vld [vmem:[#allocation8] sm:$0xf] }
 0x1dc   :  { %1567 = vmatpush.msk.msra.mxu3 %vm493_vm1, %v2295_v46  ;;  %1010 = vmatmul.f32.vlgmr.msra.gmra.mxu0 %v3208_v31  ;;  %v1483_v46 = vld [vmem:[%s3182_s0 + $0x6e8] sm:$0xff]  ;;  %vm719_vm1 = vsmask.f32 256 }
 0x1dd   :  { %978 = vmatpush.msra.mxu1 %v1487_v30  ;;  %1121 = vmatpush.msra.mxu2 %v2304_v49  ;;  %v1482_v49 = vld [vmem:[%s3182_s0 + $0x6e0] sm:$0xff] }
 0x1de   :  { %1161 = vmatpush.msra.mxu3 %v2309_v50  ;;  %v1481_v50 = vld [vmem:[%s3182_s0 + $0x6d8] sm:$0xff] }
 0x1df   :  { %979 = vmatpush.msra.mxu1 %v1486_v6  ;;  %1122 = vmatpush.msra.mxu2 %v2316_v53  ;;  %v1480_v53 = vld [vmem:[%s3182_s0 + $0x6d0] sm:$0xff] }
 0x1e0   :  { %1162 = vmatpush.msra.mxu3 %v2321_v55  ;;  %v1479_v55 = vld [vmem:[%s3182_s0 + $0x6c8] sm:$0xff] }
 0x1e1   :  { %980 = vmatpush.msra.mxu1 %v1485_v45  ;;  %1123 = vmatpush.msra.mxu2 %v2328_v57  ;;  %v1561_v57 = vld [vmem:[%s3182_s0 + $0x958] sm:$0xff]  ;;  %v891_v45 = vpop.permute.xlu0 %890 }
 0x1e2   :  { %1163 = vmatpush.msra.mxu3 %v2333_v58  ;;  %1084 = vmatpush.msrb.mxu0 %v1561_v57  ;;  %v1478_v58 = vld [vmem:[%s3182_s0 + $0x6c0] sm:$0xff] }
 0x1e3   :  { %981 = vmatpush.msra.mxu1 %v1484_v10  ;;  %1124 = vmatpush.msra.mxu2 %v2340_v61  ;;  %v1560_v61 = vld [vmem:[%s3182_s0 + $0x950] sm:$0xff] }
 0x1e4   :  { %1164 = vmatpush.msra.mxu3 %v2345_v62  ;;  %1085 = vmatpush.msrb.mxu0 %v1560_v61  ;;  %v1477_v62 = vld [vmem:[%s3182_s0 + $0x6b8] sm:$0xff] }
 0x1e5   :  { %982 = vmatpush.msra.mxu1 %v1483_v46  ;;  %1125 = vmatpush.msra.mxu2 %v2352_v0  ;;  %v1559_v0 = vld [vmem:[%s3182_s0 + $0x948] sm:$0xff]  ;;  %v893_v46 = vperm.slane %v891_v45, 0 }
 0x1e6   :  { %1165 = vmatpush.msra.mxu3 %v2357_v1  ;;  %1086 = vmatpush.msrb.mxu0 %v1559_v0  ;;  %v1476_v1 = vld [vmem:[%s3182_s0 + $0x6b0] sm:$0xff] }
 0x1e7   :  { %983 = vmatpush.msra.mxu1 %v1482_v49  ;;  %1126 = vmatpush.msra.mxu2 %v2364_v3  ;;  %v1558_v3 = vld [vmem:[%s3182_s0 + $0x940] sm:$0xff] }
 0x1e8   :  { %1166 = vmatpush.msra.mxu3 %v2369_v4  ;;  %1087 = vmatpush.msrb.mxu0 %v1558_v3  ;;  %v1555_v4 = vld [vmem:[%s3182_s0 + $0x928] sm:$0xff] }
 0x1e9   :  { %984 = vmatpush.msra.mxu1 %v1481_v50  ;;  %1127 = vmatpush.msra.mxu2 %v2376_v7  ;;  %v1557_v7 = vld [vmem:[%s3182_s0 + $0x938] sm:$0xff] }
 0x1ea   :  { %1167 = vmatpush.msra.mxu3 %v2381_v8  ;;  %1088 = vmatpush.msrb.mxu0 %v1557_v7  ;;  %v3209_v8 = vperm.slane %v2111_v41, 4  ;;  %v1552_v41 = vld [vmem:[%s3182_s0 + $0x910] sm:$0xff] }
 0x1eb   :  { %985 = vmatpush.msra.mxu1 %v1480_v53  ;;  %1128 = vmatpush.msra.mxu2 %v2388_v12  ;;  %v1554_v12 = vld [vmem:[%s3182_s0 + $0x920] sm:$0xff] }
 0x1ec   :  { %1168 = vmatpush.msra.mxu3 %v2393_v13  ;;  %v1556_v13 = vld [vmem:[%s3182_s0 + $0x930] sm:$0xff] }
 0x1ed   :  { %986 = vmatpush.msra.mxu1 %v1479_v55  ;;  %1129 = vmatpush.msra.mxu2 %v2400_v16  ;;  %v1553_v16 = vld [vmem:[%s3182_s0 + $0x918] sm:$0xff] }
 0x1ee   :  { %1169 = vmatpush.msra.mxu3 %v2405_v17  ;;  %1089 = vmatpush.msrb.mxu0 %v1556_v13  ;;  %v3210_v17 = vperm.slane %v2260_v29, 1 }
 0x1ef   :  { %987 = vmatpush.msra.mxu1 %v1478_v58  ;;  %1130 = vmatpush.msra.mxu2 %v2410_v18  ;;  %v1551_v18 = vld [vmem:[%s3182_s0 + $0x908] sm:$0xff] }
 0x1f0   :  { %1170 = vmatpush.msra.mxu3 %v2417_v19  ;;  %1562 = vmatmul.msk.f32.vlgmr.msrb.gmra.mxu0 %vm266_vm0, %v3210_v17  ;;  %v1550_v19 = vld [vmem:[%s3182_s0 + $0x900] sm:$0xff]  ;;  %vm707_vm0 = vcmask 1040384  }
 0x1f1   :  { %988 = vmatpush.msra.mxu1 %v1477_v62  ;;  %1131 = vmatpush.msra.mxu2 %v2422_v21  ;;  %v1549_v21 = vld [vmem:[%s3182_s0 + $0x8f8] sm:$0xff]  ;;  %vm3099_vm8 = vmand %vm707_vm0, %vm719_vm1 }
 0x1f2   :  { %1171 = vmatpush.msra.mxu3 %v2427_v22  ;;  %1570 = vmatpush.msk.msra.mxu0 %vm3202_vm7, %v2456_v9  ;;  %v1548_v22 = vld [vmem:[%s3182_s0 + $0x8f0] sm:$0xff]  ;;  %v1545_v9 = vld [vmem:[%s3182_s0 + $0x8d8] sm:$0xff]  ;;  %vm724_vm12 = vmor %vm3104_vm9, %vm3099_vm8 }
 0x1f3   :  { %989 = vmatpush.msra.mxu1 %v1476_v1  ;;  %1132 = vmatpush.msra.mxu2 %v2434_v24  ;;  %v1547_v24 = vld [vmem:[%s3182_s0 + $0x8e8] sm:$0xff]  ;;  %vm728_vm1 = vmor %vm727_vm13, %vm724_vm12 }
 0x1f4   :  { %990 = vmatmul.f32.vlgmr.msra.gmra.mxu1 %v3209_v8  ;;  %1172 = vmatpush.msra.mxu3 %v2439_v25  ;;  %v1546_v25 = vld [vmem:[%s3182_s0 + $0x8e0] sm:$0xff] }
 0x1f5   :  { %1054 = vmatpush.msrb.mxu1 %v1555_v4  ;;  %1228 = vmatpush.msra.mxu0 %v2463_v23  ;;  %v1544_v23 = vld [vmem:[%s3182_s0 + $0x8d0] sm:$0xff] }
 0x1f7   :  { %1055 = vmatpush.msrb.mxu1 %v1554_v12  ;;  %1229 = vmatpush.msra.mxu0 %v2469_v28  ;;  %v1543_v28 = vld [vmem:[%s3182_s0 + $0x8c8] sm:$0xff] }
 0x1f9   :  { %1056 = vmatpush.msrb.mxu1 %v1553_v16  ;;  %1230 = vmatpush.msra.mxu0 %v2477_v32  ;;  %v1542_v32 = vld [vmem:[%s3182_s0 + $0x8c0] sm:$0xff] }
 0x1fb   :  { %1057 = vmatpush.msrb.mxu1 %v1552_v41  ;;  %1572 = vmatpush.msk.msrb.mxu0 %vm3202_vm7, %v2484_v33  ;;  %v1541_v33 = vld [vmem:[%s3182_s0 + $0x8b8] sm:$0xff] }
 0x1fd   :  { %1058 = vmatpush.msrb.mxu1 %v1551_v18  ;;  %1248 = vmatpush.msrb.mxu0 %v2508_v39  ;;  %v1540_v39 = vld [vmem:[%s3182_s0 + $0x8b0] sm:$0xff]  ;;  %s1362_s0 = sshll.u32 %s3194_s12, 4  ;;  %s1363_s0 = int_to_ptr.hbm [resolvable:$true] %s1362_s0 }
 0x1ff   :  { %1059 = vmatpush.msrb.mxu1 %v1550_v19  ;;  %1249 = vmatpush.msrb.mxu0 %v2524_v43  ;;  %v3211_v43 = vperm.slane %v2260_v29, 0 }
 0x201   :  { %1060 = vmatpush.msrb.mxu1 %v1549_v21  ;;  %1250 = vmatpush.msrb.mxu0 %v2539_v56  ;;  %v585_v56 = vld [vmem:[%s3191_s9] sm:$0xf] }
 0x202   :  { %v587_v29 = vperm.slane %v585_v56, 0  ;;  %v589_v42 = vperm.slane %v585_v56, 2  ;;  %v590_v14 = vperm.slane %v585_v56, 3 }
 0x203   :  { %1061 = vmatpush.msrb.mxu1 %v1548_v22 }
 0x205   :  { %1062 = vmatpush.msrb.mxu1 %v1547_v24 }
 0x207   :  { %1063 = vmatpush.msrb.mxu1 %v1546_v25 }
 0x209   :  { %1064 = vmatpush.msrb.mxu1 %v1545_v9 }
 0x20b   :  { %1065 = vmatpush.msrb.mxu1 %v1544_v23 }
 0x20d   :  { %1066 = vmatpush.msrb.mxu1 %v1543_v28 }
 0x20f   :  { %1067 = vmatpush.msrb.mxu1 %v1542_v32 }
 0x211   :  { %1068 = vmatpush.msrb.mxu1 %v1541_v33 }
 0x213   :  { %1069 = vmatpush.msrb.mxu1 %v1540_v39 }
 0x214   :  { %1070 = vmatmul.f32.vlgmr.msrb.gmra.mxu1 %v3211_v43 }
 0x215   :  { %1576 = vmatpush.msk.msra.mxu1 %vm3202_vm7, %v2492_v35  ;;  %vm732_vm7 = vmor %vm731_vm6, %vm728_vm1 }
 0x217   :  { %1288 = vmatpush.msra.mxu1 %v2502_v38  ;;  %v588_v38 = vperm.slane %v585_v56, 1  ;;  %v1113_v56 = vld [vmem:[%s3186_s4] sm:$0x1] }
 0x219   :  { %1289 = vmatpush.msra.mxu1 %v2513_v40 }
 0x21b   :  { %1290 = vmatpush.msra.mxu1 %v2534_v47 }
 0x231   :  { %v629_v5 = vpop.f32.mrf.mxu1 }
 0x232   :  { %v630_v27 = vadd.f32 %v629_v5, %v587_v29  ;;  %v1156_v5 = vld [vmem:[%s3188_s6] sm:$0x1]  ;;  %s1373_s6 = sshll.u32 %s3195_s13, 4  ;;  %s1374_s6 = int_to_ptr.hbm [resolvable:$true] %s1373_s6 }
 0x234   :  { %v692_v63 = vmax.f32 %v630_v27, 0.0 }
 0x235   :  { %v931_v50 = vpop.f32.mrf.mxu0 }
 0x237   :  { %v669_v47 = vpop.f32.mrf.mxu2 }
 0x238   :  { %v670_v26 = vadd.f32 %v669_v47, %v589_v42  ;;  %v689_v11 = vpop.f32.mrf.mxu3 }
 0x239   :  { %v690_v15 = vadd.f32 %v689_v11, %v590_v14  ;;  %v649_v44 = vpop.f32.mrf.mxu1 }
 0x23a   :  { %v694_v60 = vmax.f32 %v670_v26, 0.0  ;;  %v650_v36 = vadd.f32 %v649_v44, %v588_v38 }
 0x23b   :  { %v695_v51 = vmax.f32 %v690_v15, 0.0 }
 0x23c   :  { %v693_v48 = vmax.f32 %v650_v36, 0.0 }
 0x23d   :  { %v701_v34 = vpack.c.bf16 %v695_v51, %v694_v60 }
 0x23e   :  { %v700_v54 = vpack.c.bf16 %v693_v48, %v692_v63 }
 0x23f   :  { %v705_v52 = vrot.slane %v701_v34, 6  ;;  %v706_v2 = vrot.slane %v701_v34, 1  ;;  %v951_v55 = vpop.f32.mrf.mxu2 }
 0x240   :  { %v704_v37 = vrot.slane %v700_v54, 3  ;;  %v971_v58 = vpop.f32.mrf.mxu3 }
 0x241   :  { %v714_v30 = vsel %vm711_vm10, %v705_v52, %v706_v2 }
 0x242   :  { %v710_v20 = vsel %vm707_vm0, %v700_v54, %v704_v37 }
 0x243   :  { %v716_v6 = vsel %vm715_vm4, %v710_v20, %v714_v30 }
 0x244   :  { %v734_v31 = vsel %vm732_vm7, %v716_v6, %v733_v59 }
 0x245   :  { %735 = vst [vmem:[#allocation8] sm:$0xf] %v734_v31 }
 0x251   :  { %v911_v10 = vpop.f32.mrf.mxu1 }
 0x252   :  { %v912_v49 = vadd.f32 %v911_v10, %v893_v46 }
 0x254   :  { %v932_v53 = vadd.f32 %v931_v50, %v912_v49 }
 0x256   :  { %v952_v57 = vadd.f32 %v951_v55, %v932_v53  ;;  %v1196_v53 = vld [vmem:[%s3189_s7 + $0x1] sm:$0x1] }
 0x258   :  { %v972_v62 = vadd.f32 %v971_v58, %v952_v57 }
 0x259   :  { %v1011_v1 = vpop.f32.mrf.mxu0 }
 0x25b   :  { %v1031_v4 = vpop.f32.mrf.mxu2 }
 0x25d   :  { %v1051_v8 = vpop.f32.mrf.mxu3 }
 0x26d   :  { %v1091_v16 = vpop.f32.mrf.mxu0 }
 0x271   :  { %v991_v61 = vpop.f32.mrf.mxu1 }
 0x272   :  { %v992_v0 = vadd.f32 %v991_v61, %v972_v62  ;;  %v1612_v61 = vld [vmem:[%s3190_s8 + $0x70] sm:$0x3f] }
 0x273   :  { %v1613_v62 = vld [vmem:[%s3190_s8 + $0x50] sm:$0xff] }
 0x274   :  { %v1012_v3 = vadd.f32 %v1011_v1, %v992_v0  ;;  %v1614_v0 = vld [vmem:[%s3190_s8 + $0x30] sm:$0xff] }
 0x275   :  { %v1615_v1 = vld [vmem:[%s3190_s8 + $0x10] sm:$0xff]  ;;  %s1340_s8 = sshll.u32 %s3192_s10, 4  ;;  %s1341_s8 = int_to_ptr.hbm [resolvable:$true] %s1340_s8 }
 0x276   :  { %v1032_v7 = vadd.f32 %v1031_v4, %v1012_v3  ;;  %v1202_v4 = vld [vmem:[%s3191_s9] sm:$0xf]  ;;  %s1722_s9 = smov [#allocation8]  }
 0x277   :  { %s1371_s10 = sshll.u32 %s1722_s9, 4  ;;  %s1372_s10 = int_to_ptr.vmem [resolvable:$true] %s1371_s10 }
 0x278   :  { %v1052_v12 = vadd.f32 %v1051_v8, %v1032_v7  ;;  %v1205_v7 = vperm.slane %v1202_v4, 1  ;;  %v1204_v8 = vperm.slane %v1202_v4, 0 }
 0x291   :  { %v1071_v13 = vpop.f32.mrf.mxu1 }
 0x292   :  { %v1072_v17 = vadd.f32 %v1071_v13, %v1052_v12 }
 0x294   :  { %v1092_v41 = vadd.f32 %v1091_v16, %v1072_v17  ;;  %v1207_v17 = vperm.slane %v1202_v4, 3 }
 0x296   :  { %v1563_v18 = vmul.f32 -1.442695, %v1092_v41 }
 0x298   :  { %1598 = vpow2.f32 %v1563_v18 }
 0x29e   :  { %v1599_v19 = vpop.eup %1598 }
 0x29f   :  { %v1097_v21 = vadd.f32 1.0, %v1599_v19  ;;  %v1206_v19 = vperm.slane %v1202_v4, 2 }
 0x2a1   :  { %1600 = vrcp.f32 %v1097_v21  ;;  %v1109_v9 = vand.u32 2147483648, %v1097_v21  ;;  %v1107_v28 = vand.u32 2147483647, %v1097_v21  ;;  %vm1103_vm8 = vweird.f32 %v1097_v21 }
 0x2a3   :  { %v1110_v33 = vor.u32 1.1754944e-38, %v1109_v9  ;;  %vm1108_vm11 = vcmp.eq.f32.partialorder %v1107_v28, 8.507059e+37 }
 0x2a7   :  { %v1601_v22 = vpop.eup %1600 }
 0x2a8   :  { %v1099_v24 = vmul.f32 %v1601_v22, %v1097_v21  ;;  %vm1104_vm7 = vweird.f32 %v1601_v22 }
 0x2a9   :  { %vm1105_vm9 = vmor %vm1103_vm8, %vm1104_vm7 }
 0x2aa   :  { %v1100_v25 = vsub.f32 1.0, %v1099_v24 }
 0x2ac   :  { %v1101_v23 = vmul.f32 %v1601_v22, %v1100_v25 }
 0x2ae   :  { %v1102_v32 = vadd.f32 %v1601_v22, %v1101_v23 }
 0x2b0   :  { %v1106_v39 = vsel %vm1105_vm9, %v1601_v22, %v1102_v32  ;;  %vm3216_vm9 = vcmask 1045504  }
 0x2b1   :  { %v1111_v43 = vsel %vm1108_vm11, %v1110_v33, %v1106_v39 }
 0x2b2   :  { %1565 = vmatmul.msk.f32.vlgmr.msra.gmra.mxu2 %vm489_vm5, %v1111_v43  ;;  %1568 = vmatmul.msk.f32.vlgmr.msra.gmra.mxu3 %vm489_vm5, %v1111_v43 }
 0x335   :  { %v1134_v29 = vpop.f32.mrf.mxu2  ;;  %v1174_v42 = vpop.f32.mrf.mxu3 }
 0x336   :  { %v1135_v14 = vadd.f32 %v1134_v29, %v1113_v56  ;;  %v1175_v35 = vadd.f32 %v1174_v42, %v1156_v5 }
 0x338   :  { %v1566_v38 = vmul.f32 -1.442695, %v1135_v14  ;;  %v1569_v40 = vmul.f32 -1.442695, %v1175_v35 }
 0x33a   :  { %1602 = vpow2.f32 %v1566_v38  ;;  %v1330_v38 = vld [vmem:[#allocation8] sm:$0xf] }
 0x33b   :  { %1604 = vpow2.f32 %v1569_v40 }
 0x340   :  { %v1603_v47 = vpop.eup %1602 }
 0x341   :  { %v1605_v27 = vpop.eup %1604  ;;  %v1140_v26 = vadd.f32 1.0, %v1603_v47 }
 0x342   :  { %v1180_v11 = vadd.f32 1.0, %v1605_v27 }
 0x343   :  { %1606 = vrcp.f32 %v1140_v26  ;;  %v1152_v63 = vand.u32 2147483648, %v1140_v26  ;;  %v1150_v52 = vand.u32 2147483647, %v1140_v26  ;;  %vm1146_vm13 = vweird.f32 %v1140_v26 }
 0x344   :  { %1608 = vrcp.f32 %v1180_v11  ;;  %v1192_v54 = vand.u32 2147483648, %v1180_v11  ;;  %v1190_v37 = vand.u32 2147483647, %v1180_v11  ;;  %vm1186_vm1 = vweird.f32 %v1180_v11 }
 0x345   :  { %v1153_v30 = vor.u32 1.1754944e-38, %v1152_v63  ;;  %vm1151_vm7 = vcmp.eq.f32.partialorder %v1150_v52, 8.507059e+37 }
 0x346   :  { %v1193_v6 = vor.u32 1.1754944e-38, %v1192_v54  ;;  %vm1191_vm8 = vcmp.eq.f32.partialorder %v1190_v37, 8.507059e+37 }
 0x349   :  { %v1607_v15 = vpop.eup %1606 }
 0x34a   :  { %v1609_v44 = vpop.eup %1608  ;;  %v1142_v60 = vmul.f32 %v1607_v15, %v1140_v26  ;;  %vm1147_vm5 = vweird.f32 %v1607_v15 }
 0x34b   :  { %v1182_v36 = vmul.f32 %v1609_v44, %v1180_v11  ;;  %vm1187_vm12 = vweird.f32 %v1609_v44  ;;  %vm1148_vm2 = vmor %vm1146_vm13, %vm1147_vm5  ;;  %vm3219_vm5 = vcmask 1041409   ;;  %vm1324_vm13 = vsmask.f32 7946 }
 0x34c   :  { %v1143_v51 = vsub.f32 1.0, %v1142_v60  ;;  %vm1188_vm6 = vmor %vm1186_vm1, %vm1187_vm12 }
 0x34d   :  { %v1183_v48 = vsub.f32 1.0, %v1182_v36  ;;  %vm1325_vm1 = vmand %vm711_vm10, %vm1324_vm13 }
 0x34e   :  { %v1144_v34 = vmul.f32 %v1607_v15, %v1143_v51 }
 0x34f   :  { %v1184_v2 = vmul.f32 %v1609_v44, %v1183_v48 }
 0x350   :  { %v1145_v59 = vadd.f32 %v1607_v15, %v1144_v34 }
 0x351   :  { %v1185_v20 = vadd.f32 %v1609_v44, %v1184_v2 }
 0x352   :  { %v1149_v31 = vsel %vm1148_vm2, %v1607_v15, %v1145_v59 }
 0x353   :  { %v1189_v45 = vsel %vm1188_vm6, %v1609_v44, %v1185_v20  ;;  %v1154_v10 = vsel %vm1151_vm7, %v1153_v30, %v1149_v31  ;;  %vm1327_vm6 = vsmask.f32 7950 }
 0x354   :  { %v1194_v46 = vsel %vm1191_vm8, %v1193_v6, %v1189_v45  ;;  %1299 = vst.msk [vmem:[#allocation3 + $0x1] sm:$0x1] %vm696_vm14, %v1154_v10  ;;  %vm1328_vm8 = vmand %vm729_vm15, %vm1327_vm6 }
 0x355   :  { %v1197_v49 = vmul.f32 0.5, %v1194_v46  ;;  %1300 = vst.msk [vmem:[#allocation5 + $0x1] sm:$0x1] %vm696_vm14, %v1194_v46  ;;  %1343 = dma.vmem_to_hbm [thread:$0]  %s1339_s1, 32, %s1341_s8, [#allocation4]  }
 0x356   :  { %1354 = dma.vmem_to_hbm [thread:$0]  %s1350_s2, 32, %s1352_s16, [#allocation6]  }
 0x357   :  { %v1198_v50 = vmul.f32 1.442695, %v1197_v49 }
 0x359   :  { %1610 = vpow2.f32 %v1198_v50 }
 0x35f   :  { %v1611_v55 = vpop.eup %1610 }
 0x360   :  { %v1200_v57 = vmul.f32 %v1611_v55, %v1196_v53 }
 0x362   :  { %v1201_v58 = vadd.f32 %v1200_v57, %v1154_v10 }
 0x364   :  { %1571 = vmatmul.msk.f32.vlgmr.msra.gmra.mxu0 %vm595_vm3, %v1201_v58  ;;  %1577 = vmatmul.msk.f32.vlgmr.msra.gmra.mxu1 %vm595_vm3, %v1201_v58  ;;  %1301 = vst.msk [vmem:[#allocation7 + $0x1] sm:$0x1] %vm696_vm14, %v1201_v58  ;;  %vm1319_vm14 = vsmask.f32 7938 }
 0x365   :  { %1574 = vmatpush.msk.msra.mxu0 %vm3216_vm9, %v1612_v61  ;;  %1365 = dma.vmem_to_hbm [thread:$0]  %s1361_s11, 32, %s1363_s0, [#allocation6]   ;;  %vm3161_vm11 = vmand %vm707_vm0, %vm1319_vm14 }
 0x367   :  { %1268 = vmatpush.msra.mxu0 %v1613_v62 }
 0x369   :  { %1269 = vmatpush.msra.mxu0 %v1614_v0 }
 0x36b   :  { %1270 = vmatpush.msra.mxu0 %v1615_v1 }
 0x36c   :  { %1573 = vmatmul.msk.f32.vlgmr.msrb.gmra.mxu0 %vm595_vm3, %v1201_v58 }
 0x374   :  { %1575 = vmatmul.msk.f32.vlgmr.msra.gmra.mxu0 %vm595_vm3, %v1201_v58  ;;  %vm1321_vm3 = vsmask.f32 7942 }
 0x375   :  { %vm1322_vm12 = vmand %vm3219_vm5, %vm1321_vm3 }
 0x376   :  { %vm1323_vm2 = vmor %vm1322_vm12, %vm3161_vm11 }
 0x377   :  { %vm3169_vm7 = vmor %vm1325_vm1, %vm1323_vm2 }
 0x378   :  { %vm1329_vm9 = vmor %vm1328_vm8, %vm3169_vm7 }
 0x3e1   :  { %v1232_v3 = vpop.f32.mrf.mxu0  ;;  %v1292_v41 = vpop.f32.mrf.mxu1 }
 0x3e2   :  { %v1233_v16 = vadd.f32 %v1232_v3, %v1204_v8  ;;  %v1293_v24 = vadd.f32 %v1292_v41, %v1207_v17 }
 0x3e4   :  { %v1295_v22 = vmax.f32 %v1233_v16, 0.0  ;;  %v1298_v28 = vmax.f32 %v1293_v24, 0.0 }
 0x3e9   :  { %v1252_v12 = vpop.f32.mrf.mxu0 }
 0x3ea   :  { %v1253_v13 = vadd.f32 %v1252_v12, %v1205_v7 }
 0x3ec   :  { %v1296_v18 = vmax.f32 %v1253_v13, 0.0 }
 0x3ee   :  { %v1302_v9 = vpack.c.bf16 %v1296_v18, %v1295_v22 }
 0x3f0   :  { %v1306_v33 = vrot.slane %v1302_v9, 3 }
 0x3f1   :  { %v1272_v25 = vpop.f32.mrf.mxu0 }
 0x3f2   :  { %v1273_v23 = vadd.f32 %v1272_v25, %v1206_v19  ;;  %v1311_v29 = vsel %vm707_vm0, %v1302_v9, %v1306_v33 }
 0x3f4   :  { %v1297_v32 = vmax.f32 %v1273_v23, 0.0 }
 0x3f6   :  { %v1303_v39 = vpack.c.bf16 %v1298_v28, %v1297_v32 }
 0x3f8   :  { %v1307_v56 = vrot.slane %v1303_v39, 6  ;;  %v1308_v5 = vrot.slane %v1303_v39, 1 }
 0x3fa   :  { %v1314_v42 = vsel %vm711_vm10, %v1307_v56, %v1308_v5 }
 0x3fb   :  { %v1315_v14 = vsel %vm715_vm4, %v1311_v29, %v1314_v42 }
 0x3fc   :  { %v1316_v35 = vshll.u32 %v1315_v14, 16 }
 0x3fe   :  { %v1331_v40 = vsel %vm1329_vm9, %v1316_v35, %v1330_v38 }
 0x3ff   :  { %1332 = vst [vmem:[#allocation8] sm:$0xf] %v1331_v40 }
 0x400   :  { %1376 = dma.vmem_to_hbm [thread:$0]  %s1372_s10, 64, %s1374_s6, [#allocation9]  }
 0x401   :  { %1712 = dma.done.wait [#allocation4], 32  }
 0x402   :  { %1713 = vsyncadd [#allocation4], 4294967264 }
 0x403   :  { %1714 = dma.done.wait [#allocation6], 64  }
 0x404   :  { %1715 = vsyncadd [#allocation6], 4294967232 }
 0x405   :  { %1716 = dma.done.wait [#allocation9], 64  }
 0x406   :  { %1717 = vsyncadd [#allocation9], 4294967232 }
 0x407   :  { %1393 = vsyncpa [#allocation4], 1 }
 0x408   :  { %1394 = vsyncpa [#allocation6], 1 }
 0x409   :  { %1395 = vsyncpa [#allocation9], 1 }

</bundles_post_ra>
